<compile_context>
chip_gen: v6e
topology: v6e:2x2x1
jax: 0.10.0
libtpu: 0.0.40
codegen_flags: <defaults>
</compile_context>

<pallas_src>
import jax
import jax.numpy as jnp
from jax.experimental import pallas as pl
from jax.experimental.pallas import tpu as pltpu

_TRANS_B = (((1,), (1,)), ((), ()))  # contract last dim of both operands (A @ B.T)


def translayer_kernel(x_ref,
                      wk_ref, bk_ref, wq_ref, bq_ref, wv_ref, bv_ref,
                      wm_ref, bm_ref, w1_ref, b1_ref, w2_ref, b2_ref,
                      o_ref):
    B, D, P = x_ref.shape
    H = wm_ref.shape[0]
    eps = 1e-5
    f32 = jnp.float32
    mdt = wk_ref.dtype                    # matmul operand dtype (bf16 or f32)
    scale = 1.0 / (float(D) ** 0.5)

    # Weights / biases loaded once per grid step (hoisted out of the batch loop).
    wk = wk_ref[...]; bk = bk_ref[...]    # [H*D, D], [H*D, 1]
    wv = wv_ref[...]; bv = bv_ref[...]
    bm = bm_ref[...]                      # [D, 1]
    w1 = w1_ref[...]; b1 = b1_ref[...]    # [D, D], [D, 1]
    w2 = w2_ref[...]; b2 = b2_ref[...]
    wq_h = [wq_ref[h] for h in range(H)]  # each [D_in, D_out]
    bq_h = [bq_ref[h] for h in range(H)]  # each [1, D_out]
    wm_h = [wm_ref[h] for h in range(H)]  # each [D_out, D_in]

    for b in range(B):                    # static unroll; B is small
        x = x_ref[b].astype(f32)          # [D, P]
        x_t = x.T                         # [P, D] (single small transpose)

        # ---- LayerNorm 1 over channels (lane axis of x_t); affine folded into weights.
        mu = jnp.mean(x_t, axis=-1, keepdims=True)
        var = jnp.mean((x_t - mu) ** 2, axis=-1, keepdims=True)
        xn_t = ((x_t - mu) * jax.lax.rsqrt(var + eps)).astype(mdt)     # [P, D]

        # ---- K / V projections: [H*D, D] contracted with [P, D] (trans_b) -> [H*D, P]
        k = jax.lax.dot_general(wk, xn_t, _TRANS_B, preferred_element_type=f32) + bk
        v = jax.lax.dot_general(wv, xn_t, _TRANS_B, preferred_element_type=f32) + bv

        # ---- Multi-head attention, per-head output-conv accumulation.
        acc = jnp.zeros((D, P), f32)
        for h in range(H):
            kh = k[h * D:(h + 1) * D].astype(mdt)          # [D, P]  (sublane slice)
            vh = v[h * D:(h + 1) * D].astype(mdt)          # [D, P]
            qh_t = (jnp.dot(xn_t, wq_h[h], preferred_element_type=f32)
                    + bq_h[h]).astype(mdt)                 # [P, D]  (query, transposed)
            # s[j, i] = sum_d q[d, j] * k[d, i]  -> softmax over keys = lane axis.
            s = jnp.dot(qh_t, kh, preferred_element_type=f32) * scale  # [Pq, Pk]
            m = jnp.max(s, axis=-1, keepdims=True)
            e = jnp.exp(s - m)
            p = (e * pl.reciprocal(jnp.sum(e, axis=-1, keepdims=True),
                                   approx=True)).astype(mdt)           # [Pq, Pk]
            # head_out[d, j] = sum_i v[d, i] * p[j, i]
            ho = jax.lax.dot_general(vh, p, _TRANS_B,
                                     preferred_element_type=f32).astype(mdt)  # [D, Pq]
            # multi-head concat + 1x1 conv == sum_h wm_h @ head_out_h
            acc = acc + jnp.dot(wm_h[h], ho, preferred_element_type=f32)

        res = acc + bm + x                                  # residual 1, [D, P]

        # ---- LayerNorm 2 over channels (sublane axis); affine folded into w1/b1.
        mu2 = jnp.mean(res, axis=0, keepdims=True)
        var2 = jnp.mean((res - mu2) ** 2, axis=0, keepdims=True)
        rn = ((res - mu2) * jax.lax.rsqrt(var2 + eps)).astype(mdt)      # [D, P]

        # ---- MLP: Conv1d(D,D,1) -> ReLU -> Conv1d(D,D,1)
        h1 = jnp.maximum(jnp.dot(w1, rn, preferred_element_type=f32) + b1,
                         0.0).astype(mdt)
        mlp = jnp.dot(w2, h1, preferred_element_type=f32) + b2          # [D, P]

        o_ref[b] = (mlp + res).astype(o_ref.dtype)          # residual 2


def _pick_batch_block(N, D, P, itemsize, budget_bytes=1 << 20):
    """Largest divisor of N that keeps the block small-ish and >= 2 grid steps (v7x)."""
    best = 1
    for b in range(1, N + 1):
        if N % b != 0:
            continue
        if N >= 2 and N // b < 2:      # keep both TensorCores busy on v7x
            continue
        if b * D * P * itemsize > budget_bytes:
            continue
        best = max(best, b)
    return best


def prepare_params(raw, head_num, matmul_dtype=jnp.bfloat16):
    """Fold the LayerNorm affines into the following conv weights and lay weights out
    for the kernel ([Cout, Cin] matrices; q and output-conv weights head-major)."""
    H = head_num
    D = raw["w1"].shape[0]
    f32 = jnp.float32
    g1, be1 = raw["g1"].astype(f32), raw["be1"].astype(f32)
    g2, be2 = raw["g2"].astype(f32), raw["be2"].astype(f32)

    def fold(w, b, g, be):
        return w * g[None, :], b + w @ be

    wk, bk = fold(raw["wk"], raw["bk"], g1, be1)
    wq, bq = fold(raw["wq"], raw["bq"], g1, be1)
    wv, bv = fold(raw["wv"], raw["bv"], g1, be1)
    w1, b1 = fold(raw["w1"], raw["b1"], g2, be2)

    wq_h = wq.reshape(H, D, D).transpose(0, 2, 1)          # [H, D_in, D_out]
    bq_h = bq.reshape(H, 1, D)                             # [H, 1, D_out]
    wm_h = raw["wm"].reshape(D, H, D).transpose(1, 0, 2)   # [H, D_out, D_in]

    md = matmul_dtype
    return {
        "wk": wk.astype(md), "bk": bk.reshape(H * D, 1).astype(f32),
        "wq": wq_h.astype(md), "bq": bq_h.astype(f32),
        "wv": wv.astype(md), "bv": bv.reshape(H * D, 1).astype(f32),
        "wm": wm_h.astype(md), "bm": raw["bm"].reshape(D, 1).astype(f32),
        "w1": w1.astype(md), "b1": b1.reshape(D, 1).astype(f32),
        "w2": raw["w2"].astype(md), "b2": raw["b2"].reshape(D, 1).astype(f32),
    }


def translayer_pallas(x_ndp, kparams, *, batch_block=None):
    """x_ndp: [N, D, P] (same layout as the PyTorch module). Returns [N, D, P]."""
    N, D, P = x_ndp.shape
    if batch_block is None:
        batch_block = _pick_batch_block(N, D, P, jnp.dtype(x_ndp.dtype).itemsize)
    assert N % batch_block == 0
    grid = (N // batch_block,)

    weight_args = (kparams["wk"], kparams["bk"], kparams["wq"], kparams["bq"],
                   kparams["wv"], kparams["bv"], kparams["wm"], kparams["bm"],
                   kparams["w1"], kparams["b1"], kparams["w2"], kparams["b2"])

    def full_spec(shape):
        nd = len(shape)
        return pl.BlockSpec(shape, lambda n, _nd=nd: (0,) * _nd)

    return pl.pallas_call(
        translayer_kernel,
        out_shape=jax.ShapeDtypeStruct((N, D, P), x_ndp.dtype),
        grid_spec=pltpu.PrefetchScalarGridSpec(
            num_scalar_prefetch=0,
            grid=grid,
            in_specs=[pl.BlockSpec((batch_block, D, P), lambda n: (n, 0, 0))]
                     + [full_spec(w.shape) for w in weight_args],
            out_specs=pl.BlockSpec((batch_block, D, P), lambda n: (n, 0, 0)),
        ),
        compiler_params=pltpu.CompilerParams(
            dimension_semantics=("parallel",)),
    )(x_ndp, *weight_args)


# ------------------- pure-JAX reference (mirrors the torch math, raw params) -------------------
def _conv1d(x, w, b):   # x [N,C,P], w [O,C], b [O]
    return jnp.einsum("oc,ncp->nop", w, x,
                      precision=jax.lax.Precision.HIGHEST) + b[None, :, None]


def _layernorm_over_D(x_ndp, gamma, beta, eps=1e-5):
    xt = jnp.transpose(x_ndp, (0, 2, 1))                   # [N,P,D]
    mu = xt.mean(-1, keepdims=True)
    var = ((xt - mu) ** 2).mean(-1, keepdims=True)
    y = (xt - mu) / jnp.sqrt(var + eps) * gamma + beta
    return jnp.transpose(y, (0, 2, 1))


def translayer_ref(x, p, H):
    N, D, P = x.shape
    hi = jax.lax.Precision.HIGHEST
    n1 = _layernorm_over_D(x, p["g1"], p["be1"])
    k = _conv1d(n1, p["wk"], p["bk"]).reshape(N, H, D, P)
    q = _conv1d(n1, p["wq"], p["bq"]).reshape(N, H, D, P)
    v = _conv1d(n1, p["wv"], p["bv"]).reshape(N, H, D, P)
    kt = jnp.transpose(k, (0, 1, 3, 2))                    # [N,H,P,D]
    attn = jnp.einsum("nhid,nhdj->nhij", kt, q, precision=hi) / (D ** 0.5)
    w = jax.nn.softmax(attn, axis=2)                       # torch Softmax(dim=2)
    sa = jnp.einsum("nhdi,nhij->nhdj", v, w, precision=hi).reshape(N, H * D, P)
    sa = _conv1d(sa, p["wm"], p["bm"])
    res = sa + x
    n2 = _layernorm_over_D(res, p["g2"], p["be2"])
    h1 = jnp.maximum(_conv1d(n2, p["w1"], p["b1"]), 0.0)
    mlp = _conv1d(h1, p["w2"], p["b2"])
    return mlp + res


# ---------------------------------------------- main ----------------------------------------------
if __name__ == "__main__":
    N, D, P, H = 2, 32, 16, 4
    key = jax.random.PRNGKey(0)
    ks = jax.random.split(key, 17)

    def nrm(k, shape, scale=0.1):
        return (scale * jax.random.normal(k, shape)).astype(jnp.float32)

    # Raw parameters in the PyTorch module's own shapes.
    raw = {
        "wk": nrm(ks[0], (H * D, D)), "bk": nrm(ks[1], (H * D,)),
        "wq": nrm(ks[2], (H * D, D)), "bq": nrm(ks[3], (H * D,)),
        "wv": nrm(ks[4], (H * D, D)), "bv": nrm(ks[5], (H * D,)),
        "wm": nrm(ks[6], (D, H * D)), "bm": nrm(ks[7], (D,)),
        "g1": 1.0 + nrm(ks[8], (D,)), "be1": nrm(ks[9], (D,)),
        "g2": 1.0 + nrm(ks[10], (D,)), "be2": nrm(ks[11], (D,)),
        "w1": nrm(ks[12], (D, D)), "b1": nrm(ks[13], (D,)),
        "w2": nrm(ks[14], (D, D)), "b2": nrm(ks[15], (D,)),
    }
    x = jax.random.normal(ks[16], (N, D, P), dtype=jnp.float32)

    ref = jax.block_until_ready(translayer_ref(x, raw, H))

    # f32 matmul path: tight check of the restructured kernel math.
    out_f32 = jax.block_until_ready(
        translayer_pallas(x, prepare_params(raw, H, matmul_dtype=jnp.float32)))
    assert out_f32.shape == (N, D, P)
    err32 = jnp.max(jnp.abs(out_f32 - ref))
    assert jnp.allclose(out_f32, ref, rtol=2e-3, atol=2e-3), f"f32 max abs err {err32}"

    # bf16 matmul path (default / fast): MXU-native operands, f32 accumulation.
    out_bf16 = jax.block_until_ready(translayer_pallas(x, prepare_params(raw, H)))
    errbf = jnp.max(jnp.abs(out_bf16 - ref))
    assert jnp.allclose(out_bf16, ref, rtol=5e-2, atol=5e-2), f"bf16 max abs err {errbf}"

    print("KERNEL_OK")
</pallas_src>

<mosaic_0001>
module attributes {stable_mosaic.version = 11 : i64} {
  func.func @translayer_kernel(%arg0: i32, %arg1: memref<1x32x16xf32, #tpu.memory_space<vmem>>, %arg2: memref<128x32xf32, #tpu.memory_space<vmem>>, %arg3: memref<128x1xf32, #tpu.memory_space<vmem>>, %arg4: memref<4x32x32xf32, #tpu.memory_space<vmem>>, %arg5: memref<4x1x32xf32, #tpu.memory_space<vmem>>, %arg6: memref<128x32xf32, #tpu.memory_space<vmem>>, %arg7: memref<128x1xf32, #tpu.memory_space<vmem>>, %arg8: memref<4x32x32xf32, #tpu.memory_space<vmem>>, %arg9: memref<32x1xf32, #tpu.memory_space<vmem>>, %arg10: memref<32x32xf32, #tpu.memory_space<vmem>>, %arg11: memref<32x1xf32, #tpu.memory_space<vmem>>, %arg12: memref<32x32xf32, #tpu.memory_space<vmem>>, %arg13: memref<32x1xf32, #tpu.memory_space<vmem>>, %arg14: memref<1x32x16xf32, #tpu.memory_space<vmem>>) attributes {dimension_semantics = [#tpu.dimension_semantics<parallel>], iteration_bounds = array<i64: 2>, scalar_prefetch = 0 : i64, scratch_operands = 0 : i64, tpu.core_type = #tpu.core_type<tc>, window_params = [{transform_indices = @transform_0, window_bounds = array<i64: 1, 32, 16>}, {pipeline_mode = #tpu.pipeline_mode<synchronous>, transform_indices = @transform_1, window_bounds = array<i64: 128, 32>}, {pipeline_mode = #tpu.pipeline_mode<synchronous>, transform_indices = @transform_2, window_bounds = array<i64: 128, 1>}, {pipeline_mode = #tpu.pipeline_mode<synchronous>, transform_indices = @transform_3, window_bounds = array<i64: 4, 32, 32>}, {pipeline_mode = #tpu.pipeline_mode<synchronous>, transform_indices = @transform_4, window_bounds = array<i64: 4, 1, 32>}, {pipeline_mode = #tpu.pipeline_mode<synchronous>, transform_indices = @transform_5, window_bounds = array<i64: 128, 32>}, {pipeline_mode = #tpu.pipeline_mode<synchronous>, transform_indices = @transform_6, window_bounds = array<i64: 128, 1>}, {pipeline_mode = #tpu.pipeline_mode<synchronous>, transform_indices = @transform_7, window_bounds = array<i64: 4, 32, 32>}, {pipeline_mode = #tpu.pipeline_mode<synchronous>, transform_indices = @transform_8, window_bounds = array<i64: 32, 1>}, {pipeline_mode = #tpu.pipeline_mode<synchronous>, transform_indices = @transform_9, window_bounds = array<i64: 32, 32>}, {pipeline_mode = #tpu.pipeline_mode<synchronous>, transform_indices = @transform_10, window_bounds = array<i64: 32, 1>}, {pipeline_mode = #tpu.pipeline_mode<synchronous>, transform_indices = @transform_11, window_bounds = array<i64: 32, 32>}, {pipeline_mode = #tpu.pipeline_mode<synchronous>, transform_indices = @transform_12, window_bounds = array<i64: 32, 1>}, {transform_indices = @transform_13, window_bounds = array<i64: 1, 32, 16>}]} {
    %c0 = arith.constant 0 : index
    %c0_0 = arith.constant 0 : index
    %0 = vector.load %arg2[%c0, %c0_0] : memref<128x32xf32, #tpu.memory_space<vmem>>, vector<128x32xf32>
    %c0_1 = arith.constant 0 : index
    %c0_2 = arith.constant 0 : index
    %1 = vector.load %arg3[%c0_1, %c0_2] : memref<128x1xf32, #tpu.memory_space<vmem>>, vector<128x1xf32>
    %c0_3 = arith.constant 0 : index
    %c0_4 = arith.constant 0 : index
    %2 = vector.load %arg6[%c0_3, %c0_4] : memref<128x32xf32, #tpu.memory_space<vmem>>, vector<128x32xf32>
    %c0_5 = arith.constant 0 : index
    %c0_6 = arith.constant 0 : index
    %3 = vector.load %arg7[%c0_5, %c0_6] : memref<128x1xf32, #tpu.memory_space<vmem>>, vector<128x1xf32>
    %c0_7 = arith.constant 0 : index
    %c0_8 = arith.constant 0 : index
    %4 = vector.load %arg9[%c0_7, %c0_8] : memref<32x1xf32, #tpu.memory_space<vmem>>, vector<32x1xf32>
    %c0_9 = arith.constant 0 : index
    %c0_10 = arith.constant 0 : index
    %5 = vector.load %arg10[%c0_9, %c0_10] : memref<32x32xf32, #tpu.memory_space<vmem>>, vector<32x32xf32>
    %c0_11 = arith.constant 0 : index
    %c0_12 = arith.constant 0 : index
    %6 = vector.load %arg11[%c0_11, %c0_12] : memref<32x1xf32, #tpu.memory_space<vmem>>, vector<32x1xf32>
    %c0_13 = arith.constant 0 : index
    %c0_14 = arith.constant 0 : index
    %7 = vector.load %arg12[%c0_13, %c0_14] : memref<32x32xf32, #tpu.memory_space<vmem>>, vector<32x32xf32>
    %c0_15 = arith.constant 0 : index
    %c0_16 = arith.constant 0 : index
    %8 = vector.load %arg13[%c0_15, %c0_16] : memref<32x1xf32, #tpu.memory_space<vmem>>, vector<32x1xf32>
    %c0_17 = arith.constant 0 : index
    %c0_18 = arith.constant 0 : index
    %c0_19 = arith.constant 0 : index
    %9 = vector.load %arg4[%c0_17, %c0_18, %c0_19] : memref<4x32x32xf32, #tpu.memory_space<vmem>>, vector<1x32x32xf32>
    %10 = vector.shape_cast %9 : vector<1x32x32xf32> to vector<32x32xf32>
    %c1 = arith.constant 1 : index
    %c0_20 = arith.constant 0 : index
    %c0_21 = arith.constant 0 : index
    %11 = vector.load %arg4[%c1, %c0_20, %c0_21] : memref<4x32x32xf32, #tpu.memory_space<vmem>>, vector<1x32x32xf32>
    %12 = vector.shape_cast %11 : vector<1x32x32xf32> to vector<32x32xf32>
    %c2 = arith.constant 2 : index
    %c0_22 = arith.constant 0 : index
    %c0_23 = arith.constant 0 : index
    %13 = vector.load %arg4[%c2, %c0_22, %c0_23] : memref<4x32x32xf32, #tpu.memory_space<vmem>>, vector<1x32x32xf32>
    %14 = vector.shape_cast %13 : vector<1x32x32xf32> to vector<32x32xf32>
    %c3 = arith.constant 3 : index
    %c0_24 = arith.constant 0 : index
    %c0_25 = arith.constant 0 : index
    %15 = vector.load %arg4[%c3, %c0_24, %c0_25] : memref<4x32x32xf32, #tpu.memory_space<vmem>>, vector<1x32x32xf32>
    %16 = vector.shape_cast %15 : vector<1x32x32xf32> to vector<32x32xf32>
    %c0_26 = arith.constant 0 : index
    %c0_27 = arith.constant 0 : index
    %c0_28 = arith.constant 0 : index
    %17 = vector.load %arg5[%c0_26, %c0_27, %c0_28] : memref<4x1x32xf32, #tpu.memory_space<vmem>>, vector<1x1x32xf32>
    %18 = vector.shape_cast %17 : vector<1x1x32xf32> to vector<1x32xf32>
    %c1_29 = arith.constant 1 : index
    %c0_30 = arith.constant 0 : index
    %c0_31 = arith.constant 0 : index
    %19 = vector.load %arg5[%c1_29, %c0_30, %c0_31] : memref<4x1x32xf32, #tpu.memory_space<vmem>>, vector<1x1x32xf32>
    %20 = vector.shape_cast %19 : vector<1x1x32xf32> to vector<1x32xf32>
    %c2_32 = arith.constant 2 : index
    %c0_33 = arith.constant 0 : index
    %c0_34 = arith.constant 0 : index
    %21 = vector.load %arg5[%c2_32, %c0_33, %c0_34] : memref<4x1x32xf32, #tpu.memory_space<vmem>>, vector<1x1x32xf32>
    %22 = vector.shape_cast %21 : vector<1x1x32xf32> to vector<1x32xf32>
    %c3_35 = arith.constant 3 : index
    %c0_36 = arith.constant 0 : index
    %c0_37 = arith.constant 0 : index
    %23 = vector.load %arg5[%c3_35, %c0_36, %c0_37] : memref<4x1x32xf32, #tpu.memory_space<vmem>>, vector<1x1x32xf32>
    %24 = vector.shape_cast %23 : vector<1x1x32xf32> to vector<1x32xf32>
    %c0_38 = arith.constant 0 : index
    %c0_39 = arith.constant 0 : index
    %c0_40 = arith.constant 0 : index
    %25 = vector.load %arg8[%c0_38, %c0_39, %c0_40] : memref<4x32x32xf32, #tpu.memory_space<vmem>>, vector<1x32x32xf32>
    %26 = vector.shape_cast %25 : vector<1x32x32xf32> to vector<32x32xf32>
    %c1_41 = arith.constant 1 : index
    %c0_42 = arith.constant 0 : index
    %c0_43 = arith.constant 0 : index
    %27 = vector.load %arg8[%c1_41, %c0_42, %c0_43] : memref<4x32x32xf32, #tpu.memory_space<vmem>>, vector<1x32x32xf32>
    %28 = vector.shape_cast %27 : vector<1x32x32xf32> to vector<32x32xf32>
    %c2_44 = arith.constant 2 : index
    %c0_45 = arith.constant 0 : index
    %c0_46 = arith.constant 0 : index
    %29 = vector.load %arg8[%c2_44, %c0_45, %c0_46] : memref<4x32x32xf32, #tpu.memory_space<vmem>>, vector<1x32x32xf32>
    %30 = vector.shape_cast %29 : vector<1x32x32xf32> to vector<32x32xf32>
    %c3_47 = arith.constant 3 : index
    %c0_48 = arith.constant 0 : index
    %c0_49 = arith.constant 0 : index
    %31 = vector.load %arg8[%c3_47, %c0_48, %c0_49] : memref<4x32x32xf32, #tpu.memory_space<vmem>>, vector<1x32x32xf32>
    %32 = vector.shape_cast %31 : vector<1x32x32xf32> to vector<32x32xf32>
    %c0_50 = arith.constant 0 : index
    %c0_51 = arith.constant 0 : index
    %c0_52 = arith.constant 0 : index
    %33 = vector.load %arg1[%c0_50, %c0_51, %c0_52] : memref<1x32x16xf32, #tpu.memory_space<vmem>>, vector<1x32x16xf32>
    %34 = vector.shape_cast %33 : vector<1x32x16xf32> to vector<32x16xf32>
    %35 = tpu.transpose %34, [1, 0] : vector<32x16xf32> -> vector<16x32xf32>
    %cst = arith.constant dense<0.000000e+00> : vector<16xf32>
    %36 = vector.multi_reduction <add>, %35, %cst [1] : vector<16x32xf32> to vector<16xf32>
    %37 = vector.shape_cast %36 : vector<16xf32> to vector<16x1xf32>
    %cst_53 = arith.constant 3.200000e+01 : f32
    %38 = vector.broadcast %cst_53 : f32 to vector<16x1xf32>
    %39 = arith.divf %37, %38 : vector<16x1xf32>
    %40 = vector.broadcast %39 : vector<16x1xf32> to vector<16x32xf32>
    %41 = arith.subf %35, %40 : vector<16x32xf32>
    %42 = arith.mulf %41, %41 : vector<16x32xf32>
    %cst_54 = arith.constant dense<0.000000e+00> : vector<16xf32>
    %43 = vector.multi_reduction <add>, %42, %cst_54 [1] : vector<16x32xf32> to vector<16xf32>
    %44 = vector.shape_cast %43 : vector<16xf32> to vector<16x1xf32>
    %cst_55 = arith.constant 3.200000e+01 : f32
    %45 = vector.broadcast %cst_55 : f32 to vector<16x1xf32>
    %46 = arith.divf %44, %45 : vector<16x1xf32>
    %47 = vector.broadcast %39 : vector<16x1xf32> to vector<16x32xf32>
    %48 = arith.subf %35, %47 : vector<16x32xf32>
    %cst_56 = arith.constant 9.99999974E-6 : f32
    %49 = vector.broadcast %cst_56 : f32 to vector<16x1xf32>
    %50 = arith.addf %46, %49 : vector<16x1xf32>
    %51 = math.rsqrt %50 : vector<16x1xf32>
    %52 = vector.broadcast %51 : vector<16x1xf32> to vector<16x32xf32>
    %53 = arith.mulf %48, %52 : vector<16x32xf32>
    %cst_57 = arith.constant dense<0.000000e+00> : vector<128x16xf32>
    %54 = tpu.matmul %0, %53, %cst_57 {dimension_numbers = #tpu.dot_dimension_numbers<[1], [1], [0], [0], [0, 0, 1, 0], [], []>} : vector<128x32xf32>, vector<16x32xf32>, vector<128x16xf32> -> vector<128x16xf32>
    %55 = vector.broadcast %1 : vector<128x1xf32> to vector<128x16xf32>
    %56 = arith.addf %54, %55 : vector<128x16xf32>
    %cst_58 = arith.constant dense<0.000000e+00> : vector<128x16xf32>
    %57 = tpu.matmul %2, %53, %cst_58 {dimension_numbers = #tpu.dot_dimension_numbers<[1], [1], [0], [0], [0, 0, 1, 0], [], []>} : vector<128x32xf32>, vector<16x32xf32>, vector<128x16xf32> -> vector<128x16xf32>
    %58 = vector.broadcast %3 : vector<128x1xf32> to vector<128x16xf32>
    %59 = arith.addf %57, %58 : vector<128x16xf32>
    %cst_59 = arith.constant 0.000000e+00 : f32
    %60 = vector.broadcast %cst_59 : f32 to vector<32x16xf32>
    %61 = vector.extract_strided_slice %56 {offsets = [0, 0], sizes = [32, 16], strides = [1, 1]} : vector<128x16xf32> to vector<32x16xf32>
    %62 = vector.extract_strided_slice %59 {offsets = [0, 0], sizes = [32, 16], strides = [1, 1]} : vector<128x16xf32> to vector<32x16xf32>
    %cst_60 = arith.constant dense<0.000000e+00> : vector<16x32xf32>
    %63 = tpu.matmul %53, %10, %cst_60 {dimension_numbers = #tpu.dot_dimension_numbers<[1], [0], [0], [1], [0, 0, 1, 1], [], []>} : vector<16x32xf32>, vector<32x32xf32>, vector<16x32xf32> -> vector<16x32xf32>
    %64 = vector.broadcast %18 : vector<1x32xf32> to vector<16x32xf32>
    %65 = arith.addf %63, %64 : vector<16x32xf32>
    %cst_61 = arith.constant dense<0.000000e+00> : vector<16x16xf32>
    %66 = tpu.matmul %65, %61, %cst_61 {dimension_numbers = #tpu.dot_dimension_numbers<[1], [0], [0], [1], [0, 0, 1, 1], [], []>} : vector<16x32xf32>, vector<32x16xf32>, vector<16x16xf32> -> vector<16x16xf32>
    %cst_62 = arith.constant 0.176776692 : f32
    %67 = vector.broadcast %cst_62 : f32 to vector<16x16xf32>
    %68 = arith.mulf %66, %67 : vector<16x16xf32>
    %cst_63 = arith.constant dense<0xFF800000> : vector<16xf32>
    %69 = vector.multi_reduction <maximumf>, %68, %cst_63 [1] : vector<16x16xf32> to vector<16xf32>
    %70 = vector.shape_cast %69 : vector<16xf32> to vector<16x1xf32>
    %71 = vector.broadcast %70 : vector<16x1xf32> to vector<16x16xf32>
    %72 = arith.subf %68, %71 : vector<16x16xf32>
    %73 = math.exp %72 : vector<16x16xf32>
    %cst_64 = arith.constant dense<0.000000e+00> : vector<16xf32>
    %74 = vector.multi_reduction <add>, %73, %cst_64 [1] : vector<16x16xf32> to vector<16xf32>
    %75 = vector.shape_cast %74 : vector<16xf32> to vector<16x1xf32>
    %76 = tpu.reciprocal %75 {approx = true} : vector<16x1xf32> -> vector<16x1xf32>
    %77 = vector.broadcast %76 : vector<16x1xf32> to vector<16x16xf32>
    %78 = arith.mulf %73, %77 : vector<16x16xf32>
    %cst_65 = arith.constant dense<0.000000e+00> : vector<32x16xf32>
    %79 = tpu.matmul %62, %78, %cst_65 {dimension_numbers = #tpu.dot_dimension_numbers<[1], [1], [0], [0], [0, 0, 1, 0], [], []>} : vector<32x16xf32>, vector<16x16xf32>, vector<32x16xf32> -> vector<32x16xf32>
    %cst_66 = arith.constant dense<0.000000e+00> : vector<32x16xf32>
    %80 = tpu.matmul %26, %79, %cst_66 {dimension_numbers = #tpu.dot_dimension_numbers<[1], [0], [0], [1], [0, 0, 1, 1], [], []>} : vector<32x32xf32>, vector<32x16xf32>, vector<32x16xf32> -> vector<32x16xf32>
    %81 = arith.addf %60, %80 : vector<32x16xf32>
    %82 = vector.extract_strided_slice %56 {offsets = [32, 0], sizes = [32, 16], strides = [1, 1]} : vector<128x16xf32> to vector<32x16xf32>
    %83 = vector.extract_strided_slice %59 {offsets = [32, 0], sizes = [32, 16], strides = [1, 1]} : vector<128x16xf32> to vector<32x16xf32>
    %cst_67 = arith.constant dense<0.000000e+00> : vector<16x32xf32>
    %84 = tpu.matmul %53, %12, %cst_67 {dimension_numbers = #tpu.dot_dimension_numbers<[1], [0], [0], [1], [0, 0, 1, 1], [], []>} : vector<16x32xf32>, vector<32x32xf32>, vector<16x32xf32> -> vector<16x32xf32>
    %85 = vector.broadcast %20 : vector<1x32xf32> to vector<16x32xf32>
    %86 = arith.addf %84, %85 : vector<16x32xf32>
    %cst_68 = arith.constant dense<0.000000e+00> : vector<16x16xf32>
    %87 = tpu.matmul %86, %82, %cst_68 {dimension_numbers = #tpu.dot_dimension_numbers<[1], [0], [0], [1], [0, 0, 1, 1], [], []>} : vector<16x32xf32>, vector<32x16xf32>, vector<16x16xf32> -> vector<16x16xf32>
    %cst_69 = arith.constant 0.176776692 : f32
    %88 = vector.broadcast %cst_69 : f32 to vector<16x16xf32>
    %89 = arith.mulf %87, %88 : vector<16x16xf32>
    %cst_70 = arith.constant dense<0xFF800000> : vector<16xf32>
    %90 = vector.multi_reduction <maximumf>, %89, %cst_70 [1] : vector<16x16xf32> to vector<16xf32>
    %91 = vector.shape_cast %90 : vector<16xf32> to vector<16x1xf32>
    %92 = vector.broadcast %91 : vector<16x1xf32> to vector<16x16xf32>
    %93 = arith.subf %89, %92 : vector<16x16xf32>
    %94 = math.exp %93 : vector<16x16xf32>
    %cst_71 = arith.constant dense<0.000000e+00> : vector<16xf32>
    %95 = vector.multi_reduction <add>, %94, %cst_71 [1] : vector<16x16xf32> to vector<16xf32>
    %96 = vector.shape_cast %95 : vector<16xf32> to vector<16x1xf32>
    %97 = tpu.reciprocal %96 {approx = true} : vector<16x1xf32> -> vector<16x1xf32>
    %98 = vector.broadcast %97 : vector<16x1xf32> to vector<16x16xf32>
    %99 = arith.mulf %94, %98 : vector<16x16xf32>
    %cst_72 = arith.constant dense<0.000000e+00> : vector<32x16xf32>
    %100 = tpu.matmul %83, %99, %cst_72 {dimension_numbers = #tpu.dot_dimension_numbers<[1], [1], [0], [0], [0, 0, 1, 0], [], []>} : vector<32x16xf32>, vector<16x16xf32>, vector<32x16xf32> -> vector<32x16xf32>
    %cst_73 = arith.constant dense<0.000000e+00> : vector<32x16xf32>
    %101 = tpu.matmul %28, %100, %cst_73 {dimension_numbers = #tpu.dot_dimension_numbers<[1], [0], [0], [1], [0, 0, 1, 1], [], []>} : vector<32x32xf32>, vector<32x16xf32>, vector<32x16xf32> -> vector<32x16xf32>
    %102 = arith.addf %81, %101 : vector<32x16xf32>
    %103 = vector.extract_strided_slice %56 {offsets = [64, 0], sizes = [32, 16], strides = [1, 1]} : vector<128x16xf32> to vector<32x16xf32>
    %104 = vector.extract_strided_slice %59 {offsets = [64, 0], sizes = [32, 16], strides = [1, 1]} : vector<128x16xf32> to vector<32x16xf32>
    %cst_74 = arith.constant dense<0.000000e+00> : vector<16x32xf32>
    %105 = tpu.matmul %53, %14, %cst_74 {dimension_numbers = #tpu.dot_dimension_numbers<[1], [0], [0], [1], [0, 0, 1, 1], [], []>} : vector<16x32xf32>, vector<32x32xf32>, vector<16x32xf32> -> vector<16x32xf32>
    %106 = vector.broadcast %22 : vector<1x32xf32> to vector<16x32xf32>
    %107 = arith.addf %105, %106 : vector<16x32xf32>
    %cst_75 = arith.constant dense<0.000000e+00> : vector<16x16xf32>
    %108 = tpu.matmul %107, %103, %cst_75 {dimension_numbers = #tpu.dot_dimension_numbers<[1], [0], [0], [1], [0, 0, 1, 1], [], []>} : vector<16x32xf32>, vector<32x16xf32>, vector<16x16xf32> -> vector<16x16xf32>
    %cst_76 = arith.constant 0.176776692 : f32
    %109 = vector.broadcast %cst_76 : f32 to vector<16x16xf32>
    %110 = arith.mulf %108, %109 : vector<16x16xf32>
    %cst_77 = arith.constant dense<0xFF800000> : vector<16xf32>
    %111 = vector.multi_reduction <maximumf>, %110, %cst_77 [1] : vector<16x16xf32> to vector<16xf32>
    %112 = vector.shape_cast %111 : vector<16xf32> to vector<16x1xf32>
    %113 = vector.broadcast %112 : vector<16x1xf32> to vector<16x16xf32>
    %114 = arith.subf %110, %113 : vector<16x16xf32>
    %115 = math.exp %114 : vector<16x16xf32>
    %cst_78 = arith.constant dense<0.000000e+00> : vector<16xf32>
    %116 = vector.multi_reduction <add>, %115, %cst_78 [1] : vector<16x16xf32> to vector<16xf32>
    %117 = vector.shape_cast %116 : vector<16xf32> to vector<16x1xf32>
    %118 = tpu.reciprocal %117 {approx = true} : vector<16x1xf32> -> vector<16x1xf32>
    %119 = vector.broadcast %118 : vector<16x1xf32> to vector<16x16xf32>
    %120 = arith.mulf %115, %119 : vector<16x16xf32>
    %cst_79 = arith.constant dense<0.000000e+00> : vector<32x16xf32>
    %121 = tpu.matmul %104, %120, %cst_79 {dimension_numbers = #tpu.dot_dimension_numbers<[1], [1], [0], [0], [0, 0, 1, 0], [], []>} : vector<32x16xf32>, vector<16x16xf32>, vector<32x16xf32> -> vector<32x16xf32>
    %cst_80 = arith.constant dense<0.000000e+00> : vector<32x16xf32>
    %122 = tpu.matmul %30, %121, %cst_80 {dimension_numbers = #tpu.dot_dimension_numbers<[1], [0], [0], [1], [0, 0, 1, 1], [], []>} : vector<32x32xf32>, vector<32x16xf32>, vector<32x16xf32> -> vector<32x16xf32>
    %123 = arith.addf %102, %122 : vector<32x16xf32>
    %124 = vector.extract_strided_slice %56 {offsets = [96, 0], sizes = [32, 16], strides = [1, 1]} : vector<128x16xf32> to vector<32x16xf32>
    %125 = vector.extract_strided_slice %59 {offsets = [96, 0], sizes = [32, 16], strides = [1, 1]} : vector<128x16xf32> to vector<32x16xf32>
    %cst_81 = arith.constant dense<0.000000e+00> : vector<16x32xf32>
    %126 = tpu.matmul %53, %16, %cst_81 {dimension_numbers = #tpu.dot_dimension_numbers<[1], [0], [0], [1], [0, 0, 1, 1], [], []>} : vector<16x32xf32>, vector<32x32xf32>, vector<16x32xf32> -> vector<16x32xf32>
    %127 = vector.broadcast %24 : vector<1x32xf32> to vector<16x32xf32>
    %128 = arith.addf %126, %127 : vector<16x32xf32>
    %cst_82 = arith.constant dense<0.000000e+00> : vector<16x16xf32>
    %129 = tpu.matmul %128, %124, %cst_82 {dimension_numbers = #tpu.dot_dimension_numbers<[1], [0], [0], [1], [0, 0, 1, 1], [], []>} : vector<16x32xf32>, vector<32x16xf32>, vector<16x16xf32> -> vector<16x16xf32>
    %cst_83 = arith.constant 0.176776692 : f32
    %130 = vector.broadcast %cst_83 : f32 to vector<16x16xf32>
    %131 = arith.mulf %129, %130 : vector<16x16xf32>
    %cst_84 = arith.constant dense<0xFF800000> : vector<16xf32>
    %132 = vector.multi_reduction <maximumf>, %131, %cst_84 [1] : vector<16x16xf32> to vector<16xf32>
    %133 = vector.shape_cast %132 : vector<16xf32> to vector<16x1xf32>
    %134 = vector.broadcast %133 : vector<16x1xf32> to vector<16x16xf32>
    %135 = arith.subf %131, %134 : vector<16x16xf32>
    %136 = math.exp %135 : vector<16x16xf32>
    %cst_85 = arith.constant dense<0.000000e+00> : vector<16xf32>
    %137 = vector.multi_reduction <add>, %136, %cst_85 [1] : vector<16x16xf32> to vector<16xf32>
    %138 = vector.shape_cast %137 : vector<16xf32> to vector<16x1xf32>
    %139 = tpu.reciprocal %138 {approx = true} : vector<16x1xf32> -> vector<16x1xf32>
    %140 = vector.broadcast %139 : vector<16x1xf32> to vector<16x16xf32>
    %141 = arith.mulf %136, %140 : vector<16x16xf32>
    %cst_86 = arith.constant dense<0.000000e+00> : vector<32x16xf32>
    %142 = tpu.matmul %125, %141, %cst_86 {dimension_numbers = #tpu.dot_dimension_numbers<[1], [1], [0], [0], [0, 0, 1, 0], [], []>} : vector<32x16xf32>, vector<16x16xf32>, vector<32x16xf32> -> vector<32x16xf32>
    %cst_87 = arith.constant dense<0.000000e+00> : vector<32x16xf32>
    %143 = tpu.matmul %32, %142, %cst_87 {dimension_numbers = #tpu.dot_dimension_numbers<[1], [0], [0], [1], [0, 0, 1, 1], [], []>} : vector<32x32xf32>, vector<32x16xf32>, vector<32x16xf32> -> vector<32x16xf32>
    %144 = arith.addf %123, %143 : vector<32x16xf32>
    %145 = vector.broadcast %4 : vector<32x1xf32> to vector<32x16xf32>
    %146 = arith.addf %144, %145 : vector<32x16xf32>
    %147 = arith.addf %146, %34 : vector<32x16xf32>
    %cst_88 = arith.constant dense<0.000000e+00> : vector<16xf32>
    %148 = vector.multi_reduction <add>, %147, %cst_88 [0] : vector<32x16xf32> to vector<16xf32>
    %149 = vector.shape_cast %148 : vector<16xf32> to vector<1x16xf32>
    %cst_89 = arith.constant 3.200000e+01 : f32
    %150 = vector.broadcast %cst_89 : f32 to vector<1x16xf32>
    %151 = arith.divf %149, %150 : vector<1x16xf32>
    %152 = vector.broadcast %151 : vector<1x16xf32> to vector<32x16xf32>
    %153 = arith.subf %147, %152 : vector<32x16xf32>
    %154 = arith.mulf %153, %153 : vector<32x16xf32>
    %cst_90 = arith.constant dense<0.000000e+00> : vector<16xf32>
    %155 = vector.multi_reduction <add>, %154, %cst_90 [0] : vector<32x16xf32> to vector<16xf32>
    %156 = vector.shape_cast %155 : vector<16xf32> to vector<1x16xf32>
    %cst_91 = arith.constant 3.200000e+01 : f32
    %157 = vector.broadcast %cst_91 : f32 to vector<1x16xf32>
    %158 = arith.divf %156, %157 : vector<1x16xf32>
    %159 = vector.broadcast %151 : vector<1x16xf32> to vector<32x16xf32>
    %160 = arith.subf %147, %159 : vector<32x16xf32>
    %cst_92 = arith.constant 9.99999974E-6 : f32
    %161 = vector.broadcast %cst_92 : f32 to vector<1x16xf32>
    %162 = arith.addf %158, %161 : vector<1x16xf32>
    %163 = math.rsqrt %162 : vector<1x16xf32>
    %164 = vector.broadcast %163 : vector<1x16xf32> to vector<32x16xf32>
    %165 = arith.mulf %160, %164 : vector<32x16xf32>
    %cst_93 = arith.constant dense<0.000000e+00> : vector<32x16xf32>
    %166 = tpu.matmul %5, %165, %cst_93 {dimension_numbers = #tpu.dot_dimension_numbers<[1], [0], [0], [1], [0, 0, 1, 1], [], []>} : vector<32x32xf32>, vector<32x16xf32>, vector<32x16xf32> -> vector<32x16xf32>
    %167 = vector.broadcast %6 : vector<32x1xf32> to vector<32x16xf32>
    %168 = arith.addf %166, %167 : vector<32x16xf32>
    %cst_94 = arith.constant 0.000000e+00 : f32
    %169 = vector.broadcast %cst_94 : f32 to vector<32x16xf32>
    %170 = arith.maximumf %168, %169 : vector<32x16xf32>
    %cst_95 = arith.constant dense<0.000000e+00> : vector<32x16xf32>
    %171 = tpu.matmul %7, %170, %cst_95 {dimension_numbers = #tpu.dot_dimension_numbers<[1], [0], [0], [1], [0, 0, 1, 1], [], []>} : vector<32x32xf32>, vector<32x16xf32>, vector<32x16xf32> -> vector<32x16xf32>
    %172 = vector.broadcast %8 : vector<32x1xf32> to vector<32x16xf32>
    %173 = arith.addf %171, %172 : vector<32x16xf32>
    %174 = arith.addf %173, %147 : vector<32x16xf32>
    %c0_96 = arith.constant 0 : index
    %c0_97 = arith.constant 0 : index
    %c0_98 = arith.constant 0 : index
    %175 = vector.load %arg14[%c0_96, %c0_97, %c0_98] : memref<1x32x16xf32, #tpu.memory_space<vmem>>, vector<1x32x16xf32>
    %176 = vector.shape_cast %175 : vector<1x32x16xf32> to vector<32x16xf32>
    %177 = vector.shape_cast %174 : vector<32x16xf32> to vector<1x32x16xf32>
    tpu.vector_store %arg14[%c0_96, %c0_97, %c0_98], %177 {strides = array<i32>} : memref<1x32x16xf32, #tpu.memory_space<vmem>>, vector<1x32x16xf32>,
    return
  }
  func.func @transform_0(%arg0: i32) -> (i32, i32, i32) {
    %c0_i32 = arith.constant 0 : i32
    %c0_i32_0 = arith.constant 0 : i32
    %c0_i32_1 = arith.constant 0 : i32
    return %arg0, %c0_i32, %c0_i32_0 : i32, i32, i32
  }
  func.func @transform_1(%arg0: i32) -> (i32, i32) {
    %c0_i32 = arith.constant 0 : i32
    %c0_i32_0 = arith.constant 0 : i32
    %c0_i32_1 = arith.constant 0 : i32
    return %c0_i32, %c0_i32_0 : i32, i32
  }
  func.func @transform_2(%arg0: i32) -> (i32, i32) {
    %c0_i32 = arith.constant 0 : i32
    %c0_i32_0 = arith.constant 0 : i32
    %c0_i32_1 = arith.constant 0 : i32
    return %c0_i32, %c0_i32_0 : i32, i32
  }
  func.func @transform_3(%arg0: i32) -> (i32, i32, i32) {
    %c0_i32 = arith.constant 0 : i32
    %c0_i32_0 = arith.constant 0 : i32
    %c0_i32_1 = arith.constant 0 : i32
    %c0_i32_2 = arith.constant 0 : i32
    return %c0_i32, %c0_i32_0, %c0_i32_1 : i32, i32, i32
  }
  func.func @transform_4(%arg0: i32) -> (i32, i32, i32) {
    %c0_i32 = arith.constant 0 : i32
    %c0_i32_0 = arith.constant 0 : i32
    %c0_i32_1 = arith.constant 0 : i32
    %c0_i32_2 = arith.constant 0 : i32
    return %c0_i32, %c0_i32_0, %c0_i32_1 : i32, i32, i32
  }
  func.func @transform_5(%arg0: i32) -> (i32, i32) {
    %c0_i32 = arith.constant 0 : i32
    %c0_i32_0 = arith.constant 0 : i32
    %c0_i32_1 = arith.constant 0 : i32
    return %c0_i32, %c0_i32_0 : i32, i32
  }
  func.func @transform_6(%arg0: i32) -> (i32, i32) {
    %c0_i32 = arith.constant 0 : i32
    %c0_i32_0 = arith.constant 0 : i32
    %c0_i32_1 = arith.constant 0 : i32
    return %c0_i32, %c0_i32_0 : i32, i32
  }
  func.func @transform_7(%arg0: i32) -> (i32, i32, i32) {
    %c0_i32 = arith.constant 0 : i32
    %c0_i32_0 = arith.constant 0 : i32
    %c0_i32_1 = arith.constant 0 : i32
    %c0_i32_2 = arith.constant 0 : i32
    return %c0_i32, %c0_i32_0, %c0_i32_1 : i32, i32, i32
  }
  func.func @transform_8(%arg0: i32) -> (i32, i32) {
    %c0_i32 = arith.constant 0 : i32
    %c0_i32_0 = arith.constant 0 : i32
    %c0_i32_1 = arith.constant 0 : i32
    return %c0_i32, %c0_i32_0 : i32, i32
  }
  func.func @transform_9(%arg0: i32) -> (i32, i32) {
    %c0_i32 = arith.constant 0 : i32
    %c0_i32_0 = arith.constant 0 : i32
    %c0_i32_1 = arith.constant 0 : i32
    return %c0_i32, %c0_i32_0 : i32, i32
  }
  func.func @transform_10(%arg0: i32) -> (i32, i32) {
    %c0_i32 = arith.constant 0 : i32
    %c0_i32_0 = arith.constant 0 : i32
    %c0_i32_1 = arith.constant 0 : i32
    return %c0_i32, %c0_i32_0 : i32, i32
  }
  func.func @transform_11(%arg0: i32) -> (i32, i32) {
    %c0_i32 = arith.constant 0 : i32
    %c0_i32_0 = arith.constant 0 : i32
    %c0_i32_1 = arith.constant 0 : i32
    return %c0_i32, %c0_i32_0 : i32, i32
  }
  func.func @transform_12(%arg0: i32) -> (i32, i32) {
    %c0_i32 = arith.constant 0 : i32
    %c0_i32_0 = arith.constant 0 : i32
    %c0_i32_1 = arith.constant 0 : i32
    return %c0_i32, %c0_i32_0 : i32, i32
  }
  func.func @transform_13(%arg0: i32) -> (i32, i32, i32) {
    %c0_i32 = arith.constant 0 : i32
    %c0_i32_0 = arith.constant 0 : i32
    %c0_i32_1 = arith.constant 0 : i32
    return %arg0, %c0_i32, %c0_i32_0 : i32, i32, i32
  }
}

</mosaic_0001>

<bundles_post_ra>
// kernel: tpu_custom_call.1
= control target key start
LH: loop header
LB: loop body
LE: loop exit
PB: predicated region body
PF: predicated region fallthrough
CT: control target
= control target key end

     0   :  { %s3811_s25 = smov 0   ;;  %s4522_s0 = inlined_call_operand.vmem [shape: f32[2,32,16], index: 0, kind: input, shape index: {}]   ;;  %s4523_s1 = inlined_call_operand.vmem [shape: f32[128,32], index: 1, kind: input, shape index: {}]   ;;  %s4524_s2 = inlined_call_operand.vmem [shape: f32[128,1], index: 2, kind: input, shape index: {}]   ;;  %s4525_s3 = inlined_call_operand.vmem [shape: f32[4,32,32], index: 3, kind: input, shape index: {}]   ;;  %s4526_s4 = inlined_call_operand.vmem [shape: f32[4,1,32], index: 4, kind: input, shape index: {}]   ;;  %s4527_s5 = inlined_call_operand.vmem [shape: f32[128,32], index: 5, kind: input, shape index: {}]   ;;  %s4528_s6 = inlined_call_operand.vmem [shape: f32[128,1], index: 6, kind: input, shape index: {}]   ;;  %s4529_s7 = inlined_call_operand.vmem [shape: f32[4,32,32], index: 7, kind: input, shape index: {}]   ;;  %s4530_s8 = inlined_call_operand.vmem [shape: f32[32,1], index: 8, kind: input, shape index: {}]   ;;  %s4531_s9 = inlined_call_operand.vmem [shape: f32[32,32], index: 9, kind: input, shape index: {}]   ;;  %s4532_s10 = inlined_call_operand.vmem [shape: f32[32,1], index: 10, kind: input, shape index: {}]   ;;  %s4533_s11 = inlined_call_operand.vmem [shape: f32[32,32], index: 11, kind: input, shape index: {}]   ;;  %s4534_s12 = inlined_call_operand.vmem [shape: f32[32,1], index: 12, kind: input, shape index: {}]   ;;  %s4535_s13 = inlined_call_operand.vmem [shape: f32[2,32,16], index: 13, kind: output, shape index: {}]  }
   0x1 LB: > { %s3110_s26 = sadd.s32 4294967295, %s3738_s25   ;;  %p3114_p0 = scmp.ge.s32.totalorder %s3738_s25, 1  ;;  %s3738_s25 = sphi %s3811_s25, %s23_s25  }
   0x2   : > { %p387_p1 = scmp.lt.s32.totalorder %s3738_s25, 3 }
   0x4   : > { %p388_p2 = pnand %p3114_p0, %p387_p1 }
   0x5   : > { %p431_p3 = scmp.lt.s32.totalorder (!%p388_p2), %s3110_s26, 1 }
   0x6   : > { %391 = sbr.rel (%p388_p2) target bundleno = 4271 (0x10af), region = 72 }
   0xb   : > { %s4537_s26 = smov (!%p431_p3, %s3110_s26), 1  ;;  %vm606_vm0 = vcmask 261120   ;;  %v441_v18 = vld [vmem:[%s4523_s1] sm:$0xff]  ;;  %v459_v19 = vld [vmem:[%s4524_s2 + $0x10] sm:$0xff]  ;;  %v3740_v20 = vmov 0   ;;  %v460_v21 = vld [vmem:[%s4524_s2 + $0x18] sm:$0xff] }
   0xc   : > { %s3252_s27 = sshll.u32 %s4537_s26, 5  ;;  %3414 = vmatprep.mubr.msk.f32.mxu0 %vm606_vm0, %v441_v18  ;;  %3689 = vset.pattern.permute.xlu1 %v3740_v20  ;;  %v458_v22 = vld [vmem:[%s4524_s2 + $0x8] sm:$0xff]  ;;  %v457_v23 = vld [vmem:[%s4524_s2] sm:$0xff]  ;;  %v528_v34 = vld [vmem:[%s4525_s3 + $0x18] sm:$0xff]  ;;  %vm1350_vm1 = vcmask 130048  }
   0xd   : > { %s3827_s30 = scalar_lea.vmem %s4522_s0, %s3252_s27  ;;  %v442_v35 = vld [vmem:[%s4523_s1 + $0x8] sm:$0xff]  ;;  %v443_v36 = vld [vmem:[%s4523_s1 + $0x10] sm:$0xff]  ;;  %v444_v38 = vld [vmem:[%s4523_s1 + $0x18] sm:$0xff]  ;;  %s440_s20 = scalar_lea.vmem %s4535_s13, %s3252_s27 }
   0xe   : > { %v570_v0 = vld [vmem:[%s3827_s30] sm:$0xff]  ;;  %v571_v1 = vld [vmem:[%s3827_s30 + $0x8] sm:$0xff]  ;;  %v572_v2 = vld [vmem:[%s3827_s30 + $0x10] sm:$0xff] }
   0xf   : > { %574 = vxpose.xlu0.b32.start [1/4] (short) (narrow) %v570_v0, 16  ;;  %v573_v3 = vld [vmem:[%s3827_s30 + $0x18] sm:$0xff]  ;;  %v527_v37 = vld [vmem:[%s4525_s3 + $0x10] sm:$0xff]  ;;  %v526_v39 = vld [vmem:[%s4525_s3 + $0x8] sm:$0xff] }
  0x10   : > { %v445_v40 = vld [vmem:[%s4523_s1 + $0x20] sm:$0xff]  ;;  %v446_v42 = vld [vmem:[%s4523_s1 + $0x28] sm:$0xff]  ;;  %v447_v43 = vld [vmem:[%s4523_s1 + $0x30] sm:$0xff] }
  0x11   : > { %v525_v41 = vld [vmem:[%s4525_s3] sm:$0xff]  ;;  %v448_v44 = vld [vmem:[%s4523_s1 + $0x38] sm:$0xff]  ;;  %v450_v46 = vld [vmem:[%s4523_s1 + $0x48] sm:$0xff] }
  0x12   : > { %v449_v45 = vld [vmem:[%s4523_s1 + $0x40] sm:$0xff]  ;;  %v451_v47 = vld [vmem:[%s4523_s1 + $0x50] sm:$0xff]  ;;  %v452_v48 = vld [vmem:[%s4523_s1 + $0x58] sm:$0xff] }
  0x13   : > { %575 = vxpose.xlu0.b32.cont [2/4] (short) (narrow) %v571_v1, 16  ;;  %v453_v49 = vld [vmem:[%s4523_s1 + $0x60] sm:$0xff]  ;;  %v454_v50 = vld [vmem:[%s4523_s1 + $0x68] sm:$0xff]  ;;  %v455_v51 = vld [vmem:[%s4523_s1 + $0x70] sm:$0xff] }
  0x14   : > { %v456_v52 = vld [vmem:[%s4523_s1 + $0x78] sm:$0xff]  ;;  %v473_v53 = vld [vmem:[%s4527_s5] sm:$0xff]  ;;  %v474_v54 = vld [vmem:[%s4527_s5 + $0x8] sm:$0xff] }
  0x15   : > { %3442 = vmatprep.mubr.msk.f32.mxu1 %vm606_vm0, %v473_v53  ;;  %v475_v55 = vld [vmem:[%s4527_s5 + $0x10] sm:$0xff]  ;;  %v476_v56 = vld [vmem:[%s4527_s5 + $0x18] sm:$0xff]  ;;  %v477_v57 = vld [vmem:[%s4527_s5 + $0x20] sm:$0xff] }
  0x16   : > { %v478_v58 = vld [vmem:[%s4527_s5 + $0x28] sm:$0xff]  ;;  %v479_v59 = vld [vmem:[%s4527_s5 + $0x30] sm:$0xff]  ;;  %v480_v60 = vld [vmem:[%s4527_s5 + $0x38] sm:$0xff] }
  0x17   : > { %576 = vxpose.xlu0.b32.cont [3/4] (short) (narrow) %v572_v2, 16  ;;  %v481_v61 = vld [vmem:[%s4527_s5 + $0x40] sm:$0xff]  ;;  %v482_v62 = vld [vmem:[%s4527_s5 + $0x48] sm:$0xff]  ;;  %v483_v63 = vld [vmem:[%s4527_s5 + $0x50] sm:$0xff] }
  0x18   : > { %v484_v0 = vld [vmem:[%s4527_s5 + $0x58] sm:$0xff]  ;;  %v485_v1 = vld [vmem:[%s4527_s5 + $0x60] sm:$0xff]  ;;  %v486_v2 = vld [vmem:[%s4527_s5 + $0x68] sm:$0xff] }
  0x1b   : > { %577 = vxpose.xlu0.b32.end [4/4] (short) (narrow) %v573_v3, 16  ;;  %v487_v3 = vld [vmem:[%s4527_s5 + $0x70] sm:$0xff] }
  0x44   : > { %3688 = vset.pattern.permute.xlu0 %v3740_v20  ;;  %v3122_v20 = vld [vmem:[%s4525_s3 + $0x38] sm:$0xff] }
  0x45   : > { %651 = vperm.xlu0 %3688, %v460_v21  }
  0x8b   : > { %v590_v4 = vpop.trf.xlu0 }
  0x8c   : > { %v607_v7 = vsel %vm606_vm0, %v590_v4, 0.0 }
  0x8f   : > { %v591_v5 = vpop.trf.xlu0 }
  0x90   : > { %v610_v6 = vsel %vm606_vm0, %v591_v5, 0.0 }
  0x91   : > { %611 = vadd.xlane.f32.xlu1 %v610_v6 }
  0x95   : > { %608 = vadd.xlane.f32.xlu1 %v607_v7 }
 0x11a   : > { %v612_v8 = vpop.xlane.xlu1 %611 }
 0x11b   : > { %v615_v9 = vmul.f32 0.03125, %v612_v8 }
 0x11d   : > { %v617_v10 = vsub.f32 %v591_v5, %v615_v9  ;;  %v652_v9 = vpop.permute.xlu0 %651 }
 0x11e   : > { %v609_v11 = vpop.xlane.xlu1 %608 }
 0x11f   : > { %v614_v12 = vmul.f32 0.03125, %v609_v11  ;;  %v619_v13 = vmul.f32 %v617_v10, %v617_v10 }
 0x121   : > { %v616_v14 = vsub.f32 %v590_v4, %v614_v12  ;;  %v623_v15 = vsel %vm606_vm0, %v619_v13, 0.0  ;;  %v488_v4 = vld [vmem:[%s4527_s5 + $0x78] sm:$0xff] }
 0x122   : > { %624 = vadd.xlane.f32.xlu1 %v623_v15 }
 0x123   : > { %v618_v16 = vmul.f32 %v616_v14, %v616_v14 }
 0x125   : > { %v620_v17 = vsel %vm606_vm0, %v618_v16, 0.0 }
 0x126   : > { %621 = vadd.xlane.f32.xlu1 %v620_v17 }
 0x137   : > { %646 = vperm.xlu1 %3689, %v459_v19  }
 0x13b   : > { %641 = vperm.xlu1 %3689, %v458_v22  }
 0x13f   : > { %636 = vperm.xlu1 %3689, %v457_v23  }
 0x1ab   : > { %v625_v24 = vpop.xlane.xlu1 %624 }
 0x1ac   : > { %v627_v25 = vmul.f32 0.03125, %v625_v24 }
 0x1ae   : > { %v629_v26 = vadd.f32 1e-05, %v627_v25 }
 0x1af   : > { %v622_v27 = vpop.xlane.xlu1 %621 }
 0x1b0   : > { %3690 = vrsqrt.f32 %v629_v26  ;;  %v626_v28 = vmul.f32 0.03125, %v622_v27 }
 0x1b2   : > { %v628_v29 = vadd.f32 1e-05, %v626_v28 }
 0x1b3   : > { %v647_v5 = vpop.permute.xlu1 %646 }
 0x1b4   : > { %3692 = vrsqrt.f32 %v628_v29 }
 0x1b7   : > { %v642_v7 = vpop.permute.xlu1 %641 }
 0x1bd   : > { %v3691_v30 = vpop.eup %3690 }
 0x1be   : > { %v3853_v31 = vmul.f32 %v3691_v30, %v617_v10 }
 0x1c0   : > { %3410 = vmatprep.subr.msk.mxu0 %vm606_vm0, %v3853_v31  ;;  %3438 = vmatprep.subr.msk.mxu1 %vm606_vm0, %v3853_v31 }
 0x1c1   : > { %v3693_v32 = vpop.eup %3692  ;;  %3411 = vmatpush3.xpose.msk.msra.mxu0 %vm606_vm0, %v3853_v31  ;;  %3439 = vmatpush3.xpose.msk.msra.mxu1 %vm606_vm0, %v3853_v31 }
 0x1c2   : > { %v3863_v33 = vmul.f32 %v3693_v32, %v616_v14  ;;  %v637_v14 = vpop.permute.xlu1 %636  ;;  %v3182_v32 = vld [vmem:[%s4526_s4] ss:$0 sm:$0xff] }
 0x1c4   : > { %3412 = vmatprep.subr.msk.mxu0 %vm606_vm0, %v3863_v33  ;;  %3440 = vmatprep.subr.msk.mxu1 %vm606_vm0, %v3863_v33 }
 0x1c5   : > { %3413 = vmatpush3.xpose.msk.msra.mxu0 %vm606_vm0, %v3863_v33  ;;  %3441 = vmatpush3.xpose.msk.msra.mxu1 %vm606_vm0, %v3863_v33 }
 0x1c6   : > { %3466 = vmatprep.subr.mxu0 %v528_v34 }
 0x1c8   : > { %3415 = vmatmul.mubr.msk.f32.vlgmr.msra.gmra.mxu0 %vm606_vm0, %v442_v35  ;;  %3443 = vmatmul.mubr.msk.f32.vlgmr.msra.gmra.mxu1 %vm606_vm0, %v474_v54 }
 0x1c9   : > { %3467 = vmatpush3.msra.mxu0 %v528_v34  ;;  %3417 = vmatprep.mubr.msk.f32.mxu0 %vm606_vm0, %v443_v36 }
 0x1ca   : > { %3468 = vmatprep.subr.mxu0 %v527_v37  ;;  %3445 = vmatprep.mubr.msk.f32.mxu1 %vm606_vm0, %v475_v55 }
 0x1cb   : > { %3469 = vmatpush3.msra.mxu0 %v527_v37  ;;  %v3121_v37 = vld [vmem:[%s4525_s3 + $0x30] sm:$0xff] }
 0x1cc   : > { %3418 = vmatmul.mubr.msk.f32.gmra.mxu0 %vm606_vm0, %v444_v38  ;;  %3470 = vmatprep.subr.mxu0 %v526_v39  ;;  %v3120_v38 = vld [vmem:[%s4525_s3 + $0x28] sm:$0xff] }
 0x1cd   : > { %3420 = vmatprep.mubr.msk.f32.mxu0 %vm606_vm0, %v445_v40  ;;  %3471 = vmatpush3.msra.mxu0 %v526_v39  ;;  %v3119_v39 = vld [vmem:[%s4525_s3 + $0x20] sm:$0xff] }
 0x1ce   : > { %3472 = vmatprep.subr.mxu0 %v525_v41  ;;  %3446 = vmatmul.mubr.msk.f32.gmra.mxu1 %vm606_vm0, %v476_v56 }
 0x1cf   : > { %3473 = vmatpush3.msra.mxu0 %v525_v41  ;;  %3448 = vmatprep.mubr.msk.f32.mxu1 %vm606_vm0, %v477_v57 }
 0x1d0   : > { %3421 = vmatmul.mubr.msk.f32.gmra.mxu0 %vm606_vm0, %v446_v42 }
 0x1d1   : > { %3423 = vmatprep.mubr.msk.f32.mxu0 %vm606_vm0, %v447_v43 }
 0x1d2   : > { %3449 = vmatmul.mubr.msk.f32.gmra.mxu1 %vm606_vm0, %v478_v58 }
 0x1d3   : > { %3451 = vmatprep.mubr.msk.f32.mxu1 %vm606_vm0, %v479_v59 }
 0x1d4   : > { %3424 = vmatmul.mubr.msk.f32.gmra.mxu0 %vm606_vm0, %v448_v44 }
 0x1d5   : > { %3426 = vmatprep.mubr.msk.f32.mxu0 %vm606_vm0, %v449_v45 }
 0x1d6   : > { %3452 = vmatmul.mubr.msk.f32.gmra.mxu1 %vm606_vm0, %v480_v60 }
 0x1d7   : > { %3454 = vmatprep.mubr.msk.f32.mxu1 %vm606_vm0, %v481_v61 }
 0x1d8   : > { %3427 = vmatmul.mubr.msk.f32.gmra.mxu0 %vm606_vm0, %v450_v46 }
 0x1d9   : > { %3429 = vmatprep.mubr.msk.f32.mxu0 %vm606_vm0, %v451_v47 }
 0x1da   : > { %3455 = vmatmul.mubr.msk.f32.gmra.mxu1 %vm606_vm0, %v482_v62  ;;  %v489_v62 = vld [vmem:[%s4528_s6] sm:$0xff] }
 0x1db   : > { %3457 = vmatprep.mubr.msk.f32.mxu1 %vm606_vm0, %v483_v63  ;;  %v490_v63 = vld [vmem:[%s4528_s6 + $0x8] sm:$0xff] }
 0x1dc   : > { %3430 = vmatmul.mubr.msk.f32.gmra.mxu0 %vm606_vm0, %v452_v48 }
 0x1dd   : > { %3432 = vmatprep.mubr.msk.f32.mxu0 %vm606_vm0, %v453_v49 }
 0x1de   : > { %3458 = vmatmul.mubr.msk.f32.gmra.mxu1 %vm606_vm0, %v484_v0  ;;  %v464_v0 = vld [vmem:[%s4524_s2 + $0x38] sm:$0xff] }
 0x1df   : > { %3460 = vmatprep.mubr.msk.f32.mxu1 %vm606_vm0, %v485_v1  ;;  %v463_v1 = vld [vmem:[%s4524_s2 + $0x30] sm:$0xff] }
 0x1e0   : > { %3433 = vmatmul.mubr.msk.f32.gmra.mxu0 %vm606_vm0, %v454_v50 }
 0x1e1   : > { %3435 = vmatprep.mubr.msk.f32.mxu0 %vm606_vm0, %v455_v51 }
 0x1e2   : > { %3461 = vmatmul.mubr.msk.f32.gmra.mxu1 %vm606_vm0, %v486_v2  ;;  %v491_v2 = vld [vmem:[%s4528_s6 + $0x10] sm:$0xff] }
 0x1e3   : > { %3463 = vmatprep.mubr.msk.f32.mxu1 %vm606_vm0, %v487_v3  ;;  %v462_v3 = vld [vmem:[%s4524_s2 + $0x28] sm:$0xff] }
 0x1e4   : > { %3436 = vmatmul.mubr.msk.f32.gmra.mxu0 %vm606_vm0, %v456_v52 }
 0x1e5   : > { %3474 = vmatprep.mubr.msk.f32.mxu0 %vm606_vm0, %v3863_v33 }
 0x1e6   : > { %3464 = vmatmul.mubr.msk.f32.gmra.mxu1 %vm606_vm0, %v488_v4  ;;  %v492_v4 = vld [vmem:[%s4528_s6 + $0x18] sm:$0xff] }
 0x1e8   : > { %3475 = vmatmul.mubr.msk.f32.vlgmr.msra.gmra.mxu0 %vm606_vm0, %v3853_v31 }
 0x288   : > { %v3416_v6 = vpop.f32.mrf.mxu0  ;;  %v4058_v40 = vpop.f32.mrf.mxu1 }
 0x289   : > { %v840_v16 = vadd.f32 %v3416_v6, %v642_v7 }
 0x28a   : > { %v834_v8 = vpop.f32.mrf.mxu0  ;;  %v1107_v41 = vpop.f32.mrf.mxu1 }
 0x28b   : > { %v835_v18 = vadd.f32 %v834_v8, %v637_v14 }
 0x28c   : > { %v3419_v10 = vpop.f32.mrf.mxu0 }
 0x28d   : > { %v850_v11 = vadd.f32 %v3419_v10, %v652_v9 }
 0x28e   : > { %v844_v12 = vpop.f32.mrf.mxu0  ;;  %v4060_v42 = vpop.f32.mrf.mxu1 }
 0x28f   : > { %v845_v13 = vadd.f32 %v844_v12, %v647_v5  ;;  %3477 = vmatprep.subr.mxu1 %v850_v11 }
 0x290   : > { %v4013_v15 = vpop.f32.mrf.mxu0  ;;  %3478 = vmatpush3.msra.mxu1 %v850_v11  ;;  %v4062_v43 = vpop.f32.mrf.mxu1 }
 0x291   : > { %3479 = vmatprep.subr.mxu1 %v845_v13 }
 0x292   : > { %v4015_v17 = vpop.f32.mrf.mxu0  ;;  %3480 = vmatpush3.msra.mxu1 %v845_v13  ;;  %v4064_v44 = vpop.f32.mrf.mxu1 }
 0x293   : > { %3481 = vmatprep.subr.mxu1 %v840_v16 }
 0x294   : > { %v4017_v19 = vpop.f32.mrf.mxu0  ;;  %3482 = vmatpush3.msra.mxu1 %v840_v16  ;;  %v4066_v45 = vpop.f32.mrf.mxu1 }
 0x295   : > { %3483 = vmatprep.subr.mxu1 %v835_v18 }
 0x296   : > { %v4022_v21 = vpop.f32.mrf.mxu0  ;;  %3484 = vmatpush3.msra.mxu1 %v835_v18  ;;  %v4068_v46 = vpop.f32.mrf.mxu1 }
 0x297   : > { %3498 = vmatprep.subr.mxu1 %v3122_v20 }
 0x298   : > { %v4024_v22 = vpop.f32.mrf.mxu0  ;;  %v4070_v47 = vpop.f32.mrf.mxu1 }
 0x29a   : > { %v4026_v23 = vpop.f32.mrf.mxu0  ;;  %v4072_v48 = vpop.f32.mrf.mxu1 }
 0x29c   : > { %v4028_v24 = vpop.f32.mrf.mxu0  ;;  %v4074_v49 = vpop.f32.mrf.mxu1 }
 0x29e   : > { %v4030_v25 = vpop.f32.mrf.mxu0  ;;  %v4076_v50 = vpop.f32.mrf.mxu1 }
 0x2a0   : > { %v4032_v26 = vpop.f32.mrf.mxu0  ;;  %v4078_v51 = vpop.f32.mrf.mxu1 }
 0x2a2   : > { %v4034_v27 = vpop.f32.mrf.mxu0  ;;  %v4080_v52 = vpop.f32.mrf.mxu1 }
 0x2a4   : > { %v4036_v28 = vpop.f32.mrf.mxu0  ;;  %v4082_v53 = vpop.f32.mrf.mxu1 }
 0x2a6   : > { %v4038_v29 = vpop.f32.mrf.mxu0  ;;  %v4084_v54 = vpop.f32.mrf.mxu1 }
 0x2a8   : > { %v3476_v30 = vpop.f32.mrf.mxu0  ;;  %v4086_v55 = vpop.f32.mrf.mxu1 }
 0x2a9   : > { %v1264_v36 = vadd.f32 %v3476_v30, %v3182_v32 }
 0x2aa   : > { %v1258_v34 = vpop.f32.mrf.mxu0 }
 0x2ab   : > { %v1259_v35 = vadd.f32 %v3182_v32, %v1258_v34 }
 0x2ad   : > { %3485 = vmatprep.mubr.msk.f32.mxu1 %vm606_vm0, %v1259_v35 }
 0x2ae   : > { %3486 = vmatmul.mubr.msk.f32.vlgmr.msra.gmra.mxu1 %vm606_vm0, %v1264_v36 }
 0x2af   : > { %3499 = vmatpush3.msra.mxu1 %v3122_v20  ;;  %3506 = vmatprep.mubr.msk.f32.mxu1 %vm606_vm0, %v3863_v33  ;;  %v461_v20 = vld [vmem:[%s4524_s2 + $0x20] sm:$0xff] }
 0x2b0   : > { %3500 = vmatprep.subr.mxu1 %v3121_v37 }
 0x2b1   : > { %3501 = vmatpush3.msra.mxu1 %v3121_v37 }
 0x2b2   : > { %3502 = vmatprep.subr.mxu1 %v3120_v38 }
 0x2b3   : > { %3503 = vmatpush3.msra.mxu1 %v3120_v38 }
 0x2b4   : > { %3504 = vmatprep.subr.mxu1 %v3119_v39 }
 0x2b5   : > { %3505 = vmatpush3.msra.mxu1 %v3119_v39 }
 0x2b6   : > { %3507 = vmatmul.mubr.msk.f32.vlgmr.msra.gmra.mxu1 %vm606_vm0, %v3853_v31 }
 0x36e   : > { %v3487_v56 = vpop.f32.mrf.mxu1 }
 0x36f   : > { %v1349_v57 = vmul.f32 0.17677669, %v3487_v56 }
 0x370   : > { %v1339_v58 = vpop.f32.mrf.mxu1 }
 0x371   : > { %v1348_v59 = vmul.f32 0.17677669, %v1339_v58  ;;  %v1354_v60 = vsel %vm1350_vm1, %v1349_v57, -inf }
 0x372   : > { %1355 = vmax.xlane.f32.xlu1 %v1354_v60 }
 0x373   : > { %v1351_v61 = vsel %vm1350_vm1, %v1348_v59, -inf }
 0x374   : > { %1352 = vmax.xlane.f32.xlu0 %v1351_v61 }
 0x376   : > { %v3508_v58 = vpop.f32.mrf.mxu1 }
 0x383   : > { %915 = vperm.xlu1 %3689, %v489_v62  }
 0x387   : > { %920 = vperm.xlu1 %3689, %v490_v63   ;;  %v1548_v63 = vpop.f32.mrf.mxu1 }
 0x38a   : > { %671 = vperm.xlu0 %3688, %v464_v0  }
 0x38b   : > { %666 = vperm.xlu1 %3689, %v463_v1  }
 0x38e   : > { %925 = vperm.xlu0 %3688, %v491_v2  }
 0x38f   : > { %661 = vperm.xlu1 %3689, %v462_v3  }
 0x392   : > { %930 = vperm.xlu0 %3688, %v492_v4  }
 0x3fb   : > { %v1356_v5 = vpop.xlane.xlu1 %1355 }
 0x3fc   : > { %v1358_v6 = vsub.f32 %v1349_v57, %v1356_v5 }
 0x3fd   : > { %v1353_v7 = vpop.xlane.xlu0 %1352 }
 0x3fe   : > { %v1361_v8 = vmul.f32 1.442695, %v1358_v6  ;;  %v1357_v9 = vsub.f32 %v1348_v59, %v1353_v7 }
 0x3ff   : > { %v916_v10 = vpop.permute.xlu1 %915 }
 0x400   : > { %3694 = vpow2.f32 %v1361_v8  ;;  %v1359_v11 = vmul.f32 1.442695, %v1357_v9  ;;  %v1108_v12 = vadd.f32 %v1107_v41, %v916_v10 }
 0x402   : > { %3696 = vpow2.f32 %v1359_v11  ;;  %3492 = vmatprep.mubr.msk.f32.mxu0 %vm1350_vm1, %v1108_v12  ;;  %v493_v11 = vld [vmem:[%s4528_s6 + $0x20] sm:$0xff]  ;;  %v495_v12 = vld [vmem:[%s4528_s6 + $0x30] sm:$0xff] }
 0x403   : > { %v921_v30 = vpop.permute.xlu1 %920 }
 0x404   : > { %v1113_v60 = vadd.f32 %v4058_v40, %v921_v30 }
 0x405   : > { %v672_v37 = vpop.permute.xlu0 %671 }
 0x406   : > { %v870_v59 = vadd.f32 %v4017_v19, %v672_v37  ;;  %v3193_v19 = vld [vmem:[%s4526_s4 + $0x1] ss:$0 sm:$0xff] }
 0x407   : > { %v667_v32 = vpop.permute.xlu1 %666 }
 0x408   : > { %v865_v0 = vadd.f32 %v4022_v21, %v667_v32  ;;  %v1554_v21 = vadd.f32 %v3508_v58, %v3193_v19  ;;  %v468_v58 = vld [vmem:[%s4524_s2 + $0x58] sm:$0xff] }
 0x409   : > { %v926_v56 = vpop.permute.xlu0 %925 }
 0x40a   : > { %v1118_v61 = vadd.f32 %v4062_v43, %v926_v56  ;;  %v1549_v43 = vadd.f32 %v3193_v19, %v1548_v63 }
 0x40b   : > { %v662_v34 = vpop.permute.xlu1 %661 }
 0x40c   : > { %v860_v2 = vadd.f32 %v4013_v15, %v662_v34 }
 0x40d   : > { %v3695_v13 = vpop.eup %3694  ;;  %v931_v62 = vpop.permute.xlu0 %930 }
 0x40e   : > { %v1366_v14 = vsel %vm1350_vm1, %v3695_v13, 0.0  ;;  %v1123_v40 = vadd.f32 %v4060_v42, %v931_v62 }
 0x40f   : > { %v3697_v16 = vpop.eup %3696  ;;  %1367 = vadd.xlane.f32.xlu1 %v1366_v14  ;;  %v467_v14 = vld [vmem:[%s4524_s2 + $0x50] sm:$0xff] }
 0x410   : > { %v1363_v18 = vsel %vm1350_vm1, %v3697_v16, 0.0 }
 0x413   : > { %1364 = vadd.xlane.f32.xlu1 %v1363_v18 }
 0x424   : > { %656 = vperm.xlu1 %3689, %v461_v20  }
 0x498   : > { %v1368_v35 = vpop.xlane.xlu1 %1367 }
 0x499   : > { %3698 = vrcp.f32 %v1368_v35 }
 0x49c   : > { %v1365_v36 = vpop.xlane.xlu1 %1364 }
 0x49d   : > { %3700 = vrcp.f32 %v1365_v36 }
 0x4a0   : > { %v657_v1 = vpop.permute.xlu1 %656 }
 0x4a1   : > { %v855_v3 = vadd.f32 %v4015_v17, %v657_v1 }
 0x4a6   : > { %v3699_v38 = vpop.eup %3698 }
 0x4a7   : > { %v1372_v39 = vmul.f32 %v3699_v38, %v3695_v13  ;;  %v496_v13 = vld [vmem:[%s4528_s6 + $0x38] sm:$0xff] }
 0x4a9   : > { %3488 = vmatprep.subr.msk.mxu0 %vm1350_vm1, %v1372_v39 }
 0x4aa   : > { %v3701_v41 = vpop.eup %3700  ;;  %3489 = vmatpush3.xpose.msk.msra.mxu0 %vm1350_vm1, %v1372_v39 }
 0x4ab   : > { %v1371_v57 = vmul.f32 %v3701_v41, %v3697_v16  ;;  %v465_v16 = vld [vmem:[%s4524_s2 + $0x40] sm:$0xff] }
 0x4ad   : > { %3490 = vmatprep.subr.msk.mxu0 %vm1350_vm1, %v1371_v57 }
 0x4ae   : > { %3491 = vmatpush3.xpose.msk.msra.mxu0 %vm1350_vm1, %v1371_v57  ;;  %v494_v57 = vld [vmem:[%s4528_s6 + $0x28] sm:$0xff] }
 0x4af   : > { %3509 = vmatprep.subr.mxu0 %v870_v59 }
 0x4b1   : > { %3493 = vmatmul.mubr.msk.f32.vlgmr.msra.gmra.mxu0 %vm1350_vm1, %v1113_v60 }
 0x4b2   : > { %3495 = vmatprep.mubr.msk.f32.mxu0 %vm1350_vm1, %v1118_v61  ;;  %3510 = vmatpush3.msra.mxu0 %v870_v59 }
 0x4b3   : > { %3511 = vmatprep.subr.mxu0 %v865_v0 }
 0x4b4   : > { %3512 = vmatpush3.msra.mxu0 %v865_v0 }
 0x4b5   : > { %3496 = vmatmul.mubr.msk.f32.gmra.mxu0 %vm1350_vm1, %v1123_v40  ;;  %3513 = vmatprep.subr.mxu0 %v860_v2 }
 0x4b6   : > { %3514 = vmatpush3.msra.mxu0 %v860_v2  ;;  %3517 = vmatprep.mubr.msk.f32.mxu0 %vm606_vm0, %v1549_v43 }
 0x4b7   : > { %3515 = vmatprep.subr.mxu0 %v855_v3 }
 0x4b8   : > { %3516 = vmatpush3.msra.mxu0 %v855_v3 }
 0x4b9   : > { %3518 = vmatmul.mubr.msk.f32.vlgmr.msra.gmra.mxu0 %vm606_vm0, %v1554_v21 }
 0x571   : > { %v4136_v4 = vpop.f32.mrf.mxu0 }
 0x573   : > { %v4138_v15 = vpop.f32.mrf.mxu0 }
 0x575   : > { %v4140_v42 = vpop.f32.mrf.mxu0 }
 0x577   : > { %v4142_v5 = vpop.f32.mrf.mxu0 }
 0x579   : > { %v3519_v17 = vpop.f32.mrf.mxu0 }
 0x57a   : > { %v1639_v6 = vmul.f32 0.17677669, %v3519_v17  ;;  %v551_v17 = vld [vmem:[%s4529_s7] sm:$0xff] }
 0x57b   : > { %v1629_v7 = vpop.f32.mrf.mxu0 }
 0x57c   : > { %v1638_v8 = vmul.f32 0.17677669, %v1629_v7  ;;  %v1643_v9 = vsel %vm1350_vm1, %v1639_v6, -inf }
 0x57d   : > { %1644 = vmax.xlane.f32.xlu0 %v1643_v9 }
 0x57e   : > { %v1640_v10 = vsel %vm1350_vm1, %v1638_v8, -inf }
 0x57f   : > { %1641 = vmax.xlane.f32.xlu1 %v1640_v10  ;;  %v3135_v10 = vld [vmem:[%s4529_s7 + $0x28] sm:$0xff] }
 0x590   : > { %935 = vperm.xlu1 %3689, %v493_v11   ;;  %v3126_v11 = vld [vmem:[%s4525_s3 + $0x58] sm:$0xff] }
 0x594   : > { %945 = vperm.xlu1 %3689, %v495_v12   ;;  %v3136_v12 = vld [vmem:[%s4529_s7 + $0x30] sm:$0xff] }
 0x598   : > { %950 = vperm.xlu1 %3689, %v496_v13   ;;  %v3125_v13 = vld [vmem:[%s4525_s3 + $0x50] sm:$0xff] }
 0x59c   : > { %686 = vperm.xlu1 %3689, %v467_v14   ;;  %v3137_v14 = vld [vmem:[%s4529_s7 + $0x38] sm:$0xff] }
 0x5a0   : > { %676 = vperm.xlu1 %3689, %v465_v16   ;;  %v3124_v16 = vld [vmem:[%s4525_s3 + $0x48] sm:$0xff] }
 0x606   : > { %v1645_v18 = vpop.xlane.xlu0 %1644 }
 0x607   : > { %v1647_v20 = vsub.f32 %v1639_v6, %v1645_v18  ;;  %v3123_v18 = vld [vmem:[%s4525_s3 + $0x40] sm:$0xff] }
 0x608   : > { %v1642_v30 = vpop.xlane.xlu1 %1641 }
 0x609   : > { %v1650_v32 = vmul.f32 1.442695, %v1647_v20  ;;  %v1646_v34 = vsub.f32 %v1638_v8, %v1642_v30 }
 0x60b   : > { %3702 = vpow2.f32 %v1650_v32  ;;  %v1648_v35 = vmul.f32 1.442695, %v1646_v34 }
 0x60c   : > { %v936_v36 = vpop.permute.xlu1 %935 }
 0x60d   : > { %3704 = vpow2.f32 %v1648_v35  ;;  %v1128_v37 = vadd.f32 %v4066_v45, %v936_v36  ;;  %v466_v45 = vld [vmem:[%s4524_s2 + $0x48] sm:$0xff]  ;;  %v3212_v36 = vld [vmem:[%s4526_s4 + $0x2] ss:$0 sm:$0xff] }
 0x60f   : > { %3524 = vmatprep.mubr.msk.f32.mxu1 %vm1350_vm1, %v1128_v37 }
 0x610   : > { %v946_v63 = vpop.permute.xlu1 %945 }
 0x611   : > { %v1138_v43 = vadd.f32 %v4070_v47, %v946_v63 }
 0x614   : > { %v951_v2 = vpop.permute.xlu1 %950 }
 0x615   : > { %v1143_v21 = vadd.f32 %v4068_v46, %v951_v2  ;;  %v552_v46 = vld [vmem:[%s4529_s7 + $0x8] sm:$0xff]  ;;  %v471_v2 = vld [vmem:[%s4524_s2 + $0x70] sm:$0xff] }
 0x618   : > { %v3703_v38 = vpop.eup %3702 }
 0x619   : > { %v1655_v39 = vsel %vm1350_vm1, %v3703_v38, 0.0 }
 0x61a   : > { %v3705_v41 = vpop.eup %3704  ;;  %1656 = vadd.xlane.f32.xlu0 %v1655_v39 }
 0x61b   : > { %v1652_v56 = vsel %vm1350_vm1, %v3705_v41, 0.0 }
 0x61e   : > { %1653 = vadd.xlane.f32.xlu0 %v1652_v56 }
 0x634   : > { %940 = vperm.xlu0 %3688, %v494_v57  }
 0x638   : > { %691 = vperm.xlu0 %3688, %v468_v58  }
 0x63c   : > { %681 = vperm.xlu0 %3688, %v466_v45  }
 0x6a3   : > { %v1657_v59 = vpop.xlane.xlu0 %1656 }
 0x6a4   : > { %3706 = vrcp.f32 %v1657_v59 }
 0x6a7   : > { %v1654_v60 = vpop.xlane.xlu0 %1653 }
 0x6a8   : > { %3708 = vrcp.f32 %v1654_v60 }
 0x6af   : > { %v941_v19 = vpop.permute.xlu0 %940 }
 0x6b0   : > { %v1133_v40 = vadd.f32 %v4064_v44, %v941_v19  ;;  %v687_v44 = vpop.permute.xlu1 %686  ;;  %v500_v19 = vld [vmem:[%s4528_s6 + $0x58] sm:$0xff] }
 0x6b1   : > { %v3707_v61 = vpop.eup %3706 }
 0x6b2   : > { %v1661_v62 = vmul.f32 %v3707_v61, %v3703_v38 }
 0x6b3   : > { %v692_v3 = vpop.permute.xlu0 %691 }
 0x6b4   : > { %3520 = vmatprep.subr.msk.mxu1 %vm1350_vm1, %v1661_v62  ;;  %v890_v47 = vadd.f32 %v4028_v24, %v692_v3  ;;  %v677_v6 = vpop.permute.xlu1 %676  ;;  %v3134_v24 = vld [vmem:[%s4529_s7 + $0x20] sm:$0xff] }
 0x6b5   : > { %v3709_v0 = vpop.eup %3708  ;;  %3521 = vmatpush3.xpose.msk.msra.mxu1 %vm1350_vm1, %v1661_v62  ;;  %v875_v7 = vadd.f32 %v4026_v23, %v677_v6  ;;  %3538 = vmatprep.mubr.msk.f32.mxu0 %vm606_vm0, %v3134_v24  ;;  %v498_v24 = vld [vmem:[%s4528_s6 + $0x48] sm:$0xff] }
 0x6b6   : > { %v1660_v1 = vmul.f32 %v3709_v0, %v3705_v41  ;;  %v497_v0 = vld [vmem:[%s4528_s6 + $0x40] sm:$0xff] }
 0x6b8   : > { %3522 = vmatprep.subr.msk.mxu1 %vm1350_vm1, %v1660_v1 }
 0x6b9   : > { %3523 = vmatpush3.xpose.msk.msra.mxu1 %vm1350_vm1, %v1660_v1  ;;  %v499_v1 = vld [vmem:[%s4528_s6 + $0x50] sm:$0xff] }
 0x6ba   : > { %3544 = vmatprep.subr.mxu1 %v4140_v42 }
 0x6bc   : > { %3525 = vmatmul.mubr.msk.f32.vlgmr.msra.gmra.mxu1 %vm1350_vm1, %v1133_v40  ;;  %v469_v40 = vld [vmem:[%s4524_s2 + $0x60] sm:$0xff] }
 0x6bd   : > { %3527 = vmatprep.mubr.msk.f32.mxu1 %vm1350_vm1, %v1138_v43  ;;  %3545 = vmatpush3.msra.mxu1 %v4140_v42  ;;  %v682_v42 = vpop.permute.xlu0 %681 }
 0x6be   : > { %3546 = vmatprep.subr.mxu1 %v4142_v5 }
 0x6bf   : > { %3547 = vmatpush3.msra.mxu1 %v4142_v5  ;;  %v885_v5 = vadd.f32 %v4030_v25, %v687_v44  ;;  %v553_v25 = vld [vmem:[%s4529_s7 + $0x10] sm:$0xff] }
 0x6c0   : > { %3528 = vmatmul.mubr.msk.f32.gmra.mxu1 %vm1350_vm1, %v1143_v21  ;;  %3548 = vmatprep.subr.mxu1 %v4136_v4 }
 0x6c1   : > { %3549 = vmatpush3.msra.mxu1 %v4136_v4  ;;  %3552 = vmatprep.mubr.msk.f32.mxu1 %vm606_vm0, %v551_v17  ;;  %v880_v4 = vadd.f32 %v4024_v22, %v682_v42  ;;  %v554_v22 = vld [vmem:[%s4529_s7 + $0x18] sm:$0xff] }
 0x6c2   : > { %3550 = vmatprep.subr.mxu1 %v4138_v15 }
 0x6c3   : > { %3551 = vmatpush3.msra.mxu1 %v4138_v15 }
 0x6c4   : > { %3569 = vmatprep.subr.mxu1 %v890_v47  ;;  %3553 = vmatmul.mubr.msk.f32.vlgmr.msra.gmra.mxu1 %vm606_vm0, %v552_v46 }
 0x6c5   : > { %3570 = vmatpush3.msra.mxu1 %v890_v47  ;;  %3555 = vmatprep.mubr.msk.f32.mxu1 %vm606_vm0, %v553_v25  ;;  %v472_v25 = vld [vmem:[%s4524_s2 + $0x78] sm:$0xff] }
 0x6c6   : > { %3571 = vmatprep.subr.mxu1 %v885_v5 }
 0x6c7   : > { %3572 = vmatpush3.msra.mxu1 %v885_v5 }
 0x6c8   : > { %3573 = vmatprep.subr.mxu1 %v880_v4  ;;  %3556 = vmatmul.mubr.msk.f32.gmra.mxu1 %vm606_vm0, %v554_v22 }
 0x6c9   : > { %3574 = vmatpush3.msra.mxu1 %v880_v4 }
 0x6ca   : > { %3575 = vmatprep.subr.mxu1 %v875_v7 }
 0x6cb   : > { %3576 = vmatpush3.msra.mxu1 %v875_v7 }
 0x77c   : > { %v3526_v23 = vpop.f32.mrf.mxu1 }
 0x77e   : > { %v1746_v15 = vpop.f32.mrf.mxu1 }
 0x780   : > { %v3529_v8 = vpop.f32.mrf.mxu1 }
 0x781   : > { %3530 = vmatprep.subr.mxu0 %v3529_v8 }
 0x782   : > { %v1756_v9 = vpop.f32.mrf.mxu1  ;;  %3531 = vmatpush3.msra.mxu0 %v3529_v8 }
 0x783   : > { %3532 = vmatprep.subr.mxu0 %v1756_v9 }
 0x784   : > { %3533 = vmatpush3.msra.mxu0 %v1756_v9  ;;  %v4257_v41 = vpop.f32.mrf.mxu1 }
 0x785   : > { %3534 = vmatprep.subr.mxu0 %v3526_v23 }
 0x786   : > { %3535 = vmatpush3.msra.mxu0 %v3526_v23  ;;  %v4259_v56 = vpop.f32.mrf.mxu1 }
 0x787   : > { %3536 = vmatprep.subr.mxu0 %v1746_v15 }
 0x788   : > { %3537 = vmatpush3.msra.mxu0 %v1746_v15  ;;  %v4261_v57 = vpop.f32.mrf.mxu1 }
 0x789   : > { %3539 = vmatmul.mubr.msk.f32.vlgmr.msra.gmra.mxu0 %vm606_vm0, %v3135_v10  ;;  %3558 = vmatprep.subr.mxu0 %v3126_v11 }
 0x78a   : > { %3559 = vmatpush3.msra.mxu0 %v3126_v11  ;;  %3541 = vmatprep.mubr.msk.f32.mxu0 %vm606_vm0, %v3136_v12  ;;  %v4263_v58 = vpop.f32.mrf.mxu1 }
 0x78b   : > { %3560 = vmatprep.subr.mxu0 %v3125_v13 }
 0x78c   : > { %3561 = vmatpush3.msra.mxu0 %v3125_v13  ;;  %v3130_v13 = vld [vmem:[%s4525_s3 + $0x78] sm:$0xff] }
 0x78d   : > { %3542 = vmatmul.mubr.msk.f32.gmra.mxu0 %vm606_vm0, %v3137_v14  ;;  %3562 = vmatprep.subr.mxu0 %v3124_v16 }
 0x78e   : > { %3563 = vmatpush3.msra.mxu0 %v3124_v16  ;;  %3566 = vmatprep.mubr.msk.f32.mxu0 %vm606_vm0, %v3863_v33 }
 0x78f   : > { %3564 = vmatprep.subr.mxu0 %v3123_v18 }
 0x790   : > { %3565 = vmatpush3.msra.mxu0 %v3123_v18 }
 0x791   : > { %3567 = vmatmul.mubr.msk.f32.vlgmr.msra.gmra.mxu0 %vm606_vm0, %v3853_v31 }
 0x849   : > { %v4244_v20 = vpop.f32.mrf.mxu0 }
 0x84b   : > { %v4246_v30 = vpop.f32.mrf.mxu0 }
 0x84d   : > { %v4248_v32 = vpop.f32.mrf.mxu0 }
 0x84f   : > { %v4250_v34 = vpop.f32.mrf.mxu0 }
 0x851   : > { %v3568_v35 = vpop.f32.mrf.mxu0 }
 0x852   : > { %v2037_v39 = vadd.f32 %v3568_v35, %v3212_v36  ;;  %v3129_v35 = vld [vmem:[%s4525_s3 + $0x70] sm:$0xff] }
 0x853   : > { %v2031_v37 = vpop.f32.mrf.mxu0 }
 0x854   : > { %v2032_v38 = vadd.f32 %v3212_v36, %v2031_v37  ;;  %v3128_v36 = vld [vmem:[%s4525_s3 + $0x68] sm:$0xff] }
 0x856   : > { %3577 = vmatprep.mubr.msk.f32.mxu1 %vm606_vm0, %v2032_v38 }
 0x857   : > { %3578 = vmatmul.mubr.msk.f32.vlgmr.msra.gmra.mxu1 %vm606_vm0, %v2037_v39 }
 0x917   : > { %v3579_v45 = vpop.f32.mrf.mxu1 }
 0x918   : > { %v2122_v59 = vmul.f32 0.17677669, %v3579_v45 }
 0x919   : > { %v2112_v60 = vpop.f32.mrf.mxu1 }
 0x91a   : > { %v2121_v61 = vmul.f32 0.17677669, %v2112_v60  ;;  %v2126_v62 = vsel %vm1350_vm1, %v2122_v59, -inf }
 0x91b   : > { %2127 = vmax.xlane.f32.xlu0 %v2126_v62  ;;  %v3140_v62 = vld [vmem:[%s4529_s7 + $0x50] sm:$0xff] }
 0x91c   : > { %v2123_v63 = vsel %vm1350_vm1, %v2121_v61, -inf }
 0x91d   : > { %2124 = vmax.xlane.f32.xlu1 %v2123_v63 }
 0x92e   : > { %955 = vperm.xlu1 %3689, %v497_v0  }
 0x932   : > { %965 = vperm.xlu1 %3689, %v499_v1  }
 0x936   : > { %970 = vperm.xlu1 %3689, %v500_v19  }
 0x93a   : > { %706 = vperm.xlu1 %3689, %v471_v2  }
 0x93e   : > { %696 = vperm.xlu1 %3689, %v469_v40   ;;  %v3227_v40 = vld [vmem:[%s4526_s4 + $0x3] ss:$0 sm:$0xff] }
 0x9a4   : > { %v2128_v43 = vpop.xlane.xlu0 %2127 }
 0x9a5   : > { %v2130_v3 = vsub.f32 %v2122_v59, %v2128_v43 }
 0x9a6   : > { %v2125_v21 = vpop.xlane.xlu1 %2124 }
 0x9a7   : > { %v2133_v17 = vmul.f32 1.442695, %v2130_v3  ;;  %v2129_v44 = vsub.f32 %v2121_v61, %v2125_v21 }
 0x9a9   : > { %3710 = vpow2.f32 %v2133_v17  ;;  %v2131_v46 = vmul.f32 1.442695, %v2129_v44  ;;  %v1941_v17 = vadd.f32 %v4259_v56, %v4246_v30 }
 0x9aa   : > { %v956_v47 = vpop.permute.xlu1 %955 }
 0x9ab   : > { %3712 = vpow2.f32 %v2131_v46  ;;  %v1148_v42 = vadd.f32 %v4074_v49, %v956_v47  ;;  %v470_v49 = vld [vmem:[%s4524_s2 + $0x68] sm:$0xff]  ;;  %v1956_v46 = vadd.f32 %v4261_v57, %v4248_v32  ;;  %v501_v57 = vld [vmem:[%s4528_s6 + $0x60] sm:$0xff] }
 0x9ad   : > { %3584 = vmatprep.mubr.msk.f32.mxu0 %vm1350_vm1, %v1148_v42 }
 0x9ae   : > { %v966_v10 = vpop.permute.xlu1 %965 }
 0x9af   : > { %v1158_v16 = vadd.f32 %v4078_v51, %v966_v10 }
 0x9b2   : > { %v971_v18 = vpop.permute.xlu1 %970 }
 0x9b3   : > { %v1163_v37 = vadd.f32 %v4076_v50, %v971_v18  ;;  %v3138_v50 = vld [vmem:[%s4529_s7 + $0x40] sm:$0xff] }
 0x9b4   : > { %3598 = vmatprep.mubr.msk.f32.mxu1 %vm606_vm0, %v3138_v50  ;;  %v502_v50 = vld [vmem:[%s4528_s6 + $0x68] sm:$0xff] }
 0x9b6   : > { %v3711_v5 = vpop.eup %3710 }
 0x9b7   : > { %v2138_v6 = vsel %vm1350_vm1, %v3711_v5, 0.0 }
 0x9b8   : > { %v3713_v4 = vpop.eup %3712  ;;  %2139 = vadd.xlane.f32.xlu0 %v2138_v6 }
 0x9b9   : > { %v2135_v7 = vsel %vm1350_vm1, %v3713_v4, 0.0 }
 0x9bc   : > { %2136 = vadd.xlane.f32.xlu0 %v2135_v7 }
 0x9d2   : > { %960 = vperm.xlu0 %3688, %v498_v24  }
 0x9d6   : > { %711 = vperm.xlu0 %3688, %v472_v25   ;;  %v506_v25 = vld [vmem:[%s4530_s8 + $0x8] sm:$0xff] }
 0x9da   : > { %701 = vperm.xlu0 %3688, %v470_v49   ;;  %v508_v49 = vld [vmem:[%s4530_s8 + $0x18] sm:$0xff] }
 0xa41   : > { %v2140_v22 = vpop.xlane.xlu0 %2139 }
 0xa42   : > { %3714 = vrcp.f32 %v2140_v22  ;;  %v515_v22 = vld [vmem:[%s4532_s10 + $0x10] sm:$0xff] }
 0xa45   : > { %v2137_v23 = vpop.xlane.xlu0 %2136 }
 0xa46   : > { %3716 = vrcp.f32 %v2137_v23  ;;  %v513_v23 = vld [vmem:[%s4532_s10] sm:$0xff] }
 0xa4d   : > { %v961_v12 = vpop.permute.xlu0 %960 }
 0xa4e   : > { %v1153_v14 = vadd.f32 %v4072_v48, %v961_v12  ;;  %v3127_v48 = vld [vmem:[%s4525_s3 + $0x60] sm:$0xff] }
 0xa4f   : > { %v3715_v15 = vpop.eup %3714 }
 0xa50   : > { %v2144_v8 = vmul.f32 %v3715_v15, %v3711_v5  ;;  %v1951_v5 = vadd.f32 %v4263_v58, %v4250_v34  ;;  %v503_v34 = vld [vmem:[%s4528_s6 + $0x70] sm:$0xff]  ;;  %v504_v58 = vld [vmem:[%s4528_s6 + $0x78] sm:$0xff]  ;;  %v522_v15 = vld [vmem:[%s4534_s12 + $0x8] sm:$0xff] }
 0xa51   : > { %v712_v45 = vpop.permute.xlu0 %711 }
 0xa52   : > { %3580 = vmatprep.subr.msk.mxu0 %vm1350_vm1, %v2144_v8  ;;  %v910_v61 = vadd.f32 %v4036_v28, %v712_v45  ;;  %v3141_v28 = vld [vmem:[%s4529_s7 + $0x58] sm:$0xff]  ;;  %v521_v45 = vld [vmem:[%s4534_s12] sm:$0xff] }
 0xa53   : > { %v3717_v9 = vpop.eup %3716  ;;  %3581 = vmatpush3.xpose.msk.msra.mxu0 %vm1350_vm1, %v2144_v8  ;;  %v524_v8 = vld [vmem:[%s4534_s12 + $0x18] sm:$0xff] }
 0xa54   : > { %v2143_v11 = vmul.f32 %v3717_v9, %v3713_v4 }
 0xa55   : > { %v702_v63 = vpop.permute.xlu0 %701 }
 0xa56   : > { %3582 = vmatprep.subr.msk.mxu0 %vm1350_vm1, %v2143_v11  ;;  %v900_v2 = vadd.f32 %v4032_v26, %v702_v63  ;;  %v1946_v26 = vadd.f32 %v4257_v41, %v4244_v20 }
 0xa57   : > { %3583 = vmatpush3.xpose.msk.msra.mxu0 %vm1350_vm1, %v2143_v11 }
 0xa58   : > { %3604 = vmatprep.subr.mxu0 %v3130_v13 }
 0xa5a   : > { %3585 = vmatmul.mubr.msk.f32.vlgmr.msra.gmra.mxu0 %vm1350_vm1, %v1153_v14 }
 0xa5b   : > { %3587 = vmatprep.mubr.msk.f32.mxu0 %vm1350_vm1, %v1158_v16  ;;  %3605 = vmatpush3.msra.mxu0 %v3130_v13 }
 0xa5c   : > { %3606 = vmatprep.subr.mxu0 %v3129_v35 }
 0xa5d   : > { %3607 = vmatpush3.msra.mxu0 %v3129_v35 }
 0xa5e   : > { %3588 = vmatmul.mubr.msk.f32.gmra.mxu0 %vm1350_vm1, %v1163_v37  ;;  %3608 = vmatprep.subr.mxu0 %v3128_v36 }
 0xa5f   : > { %3609 = vmatpush3.msra.mxu0 %v3128_v36  ;;  %3612 = vmatprep.mubr.msk.f32.mxu0 %vm606_vm0, %v3863_v33  ;;  %v707_v33 = vpop.permute.xlu1 %706 }
 0xa60   : > { %3610 = vmatprep.subr.mxu0 %v3127_v48  ;;  %v905_v0 = vadd.f32 %v4038_v29, %v707_v33 }
 0xa61   : > { %3611 = vmatpush3.msra.mxu0 %v3127_v48 }
 0xa62   : > { %3613 = vmatmul.mubr.msk.f32.vlgmr.msra.gmra.mxu0 %vm606_vm0, %v3853_v31  ;;  %v3139_v31 = vld [vmem:[%s4529_s7 + $0x48] sm:$0xff] }
 0xa63   : > { %v697_v19 = vpop.permute.xlu1 %696 }
 0xa64   : > { %v895_v43 = vadd.f32 %v4034_v27, %v697_v19 }
 0xb1a   : > { %v3586_v51 = vpop.f32.mrf.mxu0 }
 0xb1c   : > { %v2229_v38 = vpop.f32.mrf.mxu0 }
 0xb1e   : > { %v3589_v39 = vpop.f32.mrf.mxu0 }
 0xb1f   : > { %3590 = vmatprep.subr.mxu1 %v3589_v39 }
 0xb20   : > { %v2239_v59 = vpop.f32.mrf.mxu0  ;;  %3591 = vmatpush3.msra.mxu1 %v3589_v39  ;;  %v514_v39 = vld [vmem:[%s4532_s10 + $0x8] sm:$0xff] }
 0xb21   : > { %3592 = vmatprep.subr.mxu1 %v2239_v59 }
 0xb22   : > { %3593 = vmatpush3.msra.mxu1 %v2239_v59  ;;  %v3614_v60 = vpop.f32.mrf.mxu0  ;;  %v523_v59 = vld [vmem:[%s4534_s12 + $0x10] sm:$0xff] }
 0xb23   : > { %3594 = vmatprep.subr.mxu1 %v3586_v51  ;;  %v2427_v3 = vadd.f32 %v3614_v60, %v3227_v40 }
 0xb24   : > { %3595 = vmatpush3.msra.mxu1 %v3586_v51  ;;  %v2421_v1 = vpop.f32.mrf.mxu0  ;;  %v505_v51 = vld [vmem:[%s4530_s8] sm:$0xff] }
 0xb25   : > { %3596 = vmatprep.subr.mxu1 %v2229_v38  ;;  %v2422_v29 = vadd.f32 %v3227_v40, %v2421_v1 }
 0xb26   : > { %3597 = vmatpush3.msra.mxu1 %v2229_v38  ;;  %v516_v38 = vld [vmem:[%s4532_s10 + $0x18] sm:$0xff] }
 0xb27   : > { %3599 = vmatmul.mubr.msk.f32.vlgmr.msra.gmra.mxu1 %vm606_vm0, %v3139_v31  ;;  %3615 = vmatprep.subr.mxu1 %v910_v61 }
 0xb28   : > { %3616 = vmatpush3.msra.mxu1 %v910_v61  ;;  %3601 = vmatprep.mubr.msk.f32.mxu1 %vm606_vm0, %v3140_v62 }
 0xb29   : > { %3617 = vmatprep.subr.mxu1 %v905_v0 }
 0xb2a   : > { %3618 = vmatpush3.msra.mxu1 %v905_v0 }
 0xb2b   : > { %3602 = vmatmul.mubr.msk.f32.gmra.mxu1 %vm606_vm0, %v3141_v28  ;;  %3619 = vmatprep.subr.mxu1 %v900_v2 }
 0xb2c   : > { %3620 = vmatpush3.msra.mxu1 %v900_v2  ;;  %3623 = vmatprep.mubr.msk.f32.mxu1 %vm606_vm0, %v2422_v29  ;;  %v3142_v29 = vld [vmem:[%s4529_s7 + $0x60] sm:$0xff] }
 0xb2d   : > { %3621 = vmatprep.subr.mxu1 %v895_v43 }
 0xb2e   : > { %3622 = vmatpush3.msra.mxu1 %v895_v43 }
 0xb2f   : > { %3624 = vmatmul.mubr.msk.f32.vlgmr.msra.gmra.mxu1 %vm606_vm0, %v2427_v3 }
 0xb30   : > { %3644 = vmatprep.mubr.msk.f32.mxu1 %vm606_vm0, %v3142_v29 }
 0xbe7   : > { %v3600_v21 = vpop.f32.mrf.mxu1 }
 0xbe8   : > { %v4350_v44 = vadd.f32 %v3600_v21, %v1946_v26  ;;  %v3144_v26 = vld [vmem:[%s4529_s7 + $0x70] sm:$0xff]  ;;  %v3145_v21 = vld [vmem:[%s4529_s7 + $0x78] sm:$0xff] }
 0xbe9   : > { %v2326_v27 = vpop.f32.mrf.mxu1 }
 0xbea   : > { %v4354_v47 = vadd.f32 %v2326_v27, %v1941_v17  ;;  %v509_v17 = vld [vmem:[%s4531_s9] sm:$0xff] }
 0xbeb   : > { %v3603_v42 = vpop.f32.mrf.mxu1 }
 0xbec   : > { %v4358_v6 = vadd.f32 %v3603_v42, %v1956_v46 }
 0xbed   : > { %v2336_v4 = vpop.f32.mrf.mxu1 }
 0xbee   : > { %v4360_v20 = vadd.f32 %v2336_v4, %v1951_v5 }
 0xbef   : > { %v3625_v41 = vpop.f32.mrf.mxu1 }
 0xbf0   : > { %v2512_v7 = vmul.f32 0.17677669, %v3625_v41 }
 0xbf1   : > { %v2502_v30 = vpop.f32.mrf.mxu1 }
 0xbf2   : > { %v2511_v56 = vmul.f32 0.17677669, %v2502_v30  ;;  %v2516_v24 = vsel %vm1350_vm1, %v2512_v7, -inf }
 0xbf3   : > { %2517 = vmax.xlane.f32.xlu0 %v2516_v24 }
 0xbf4   : > { %v2513_v32 = vsel %vm1350_vm1, %v2511_v56, -inf }
 0xbf5   : > { %2514 = vmax.xlane.f32.xlu1 %v2513_v32 }
 0xc06   : > { %975 = vperm.xlu1 %3689, %v501_v57  }
 0xc0a   : > { %985 = vperm.xlu1 %3689, %v503_v34   ;;  %v3728_v34 = vld [vmem:[%s3827_s30 + $0x8] sm:$0xff] }
 0xc0e   : > { %990 = vperm.xlu1 %3689, %v504_v58  }
 0xc12   : > { %2746 = vperm.xlu1 %3689, %v506_v25   ;;  %v3729_v25 = vld [vmem:[%s3827_s30] sm:$0xff] }
 0xc16   : > { %2756 = vperm.xlu1 %3689, %v508_v49  }
 0xc1a   : > { %2821 = vperm.xlu1 %3689, %v515_v22  }
 0xc1e   : > { %2811 = vperm.xlu1 %3689, %v513_v23  }
 0xc22   : > { %2937 = vperm.xlu1 %3689, %v522_v15  }
 0xc26   : > { %2947 = vperm.xlu1 %3689, %v524_v8  }
 0xc7c   : > { %v2518_v9 = vpop.xlane.xlu0 %2517 }
 0xc7d   : > { %v2520_v10 = vsub.f32 %v2512_v7, %v2518_v9 }
 0xc7e   : > { %v2515_v11 = vpop.xlane.xlu1 %2514 }
 0xc7f   : > { %v2523_v12 = vmul.f32 1.442695, %v2520_v10  ;;  %v2519_v13 = vsub.f32 %v2511_v56, %v2515_v11  ;;  %v3731_v10 = vld [vmem:[%s3827_s30 + $0x10] sm:$0xff] }
 0xc81   : > { %3718 = vpow2.f32 %v2523_v12  ;;  %v2521_v14 = vmul.f32 1.442695, %v2519_v13 }
 0xc82   : > { %v976_v16 = vpop.permute.xlu1 %975 }
 0xc83   : > { %3720 = vpow2.f32 %v2521_v14  ;;  %v1168_v18 = vadd.f32 %v4082_v53, %v976_v16  ;;  %v507_v53 = vld [vmem:[%s4530_s8 + $0x10] sm:$0xff] }
 0xc85   : > { %3630 = vmatprep.mubr.msk.f32.mxu0 %vm1350_vm1, %v1168_v18 }
 0xc86   : > { %v986_v63 = vpop.permute.xlu1 %985 }
 0xc87   : > { %v1178_v28 = vadd.f32 %v4086_v55, %v986_v63 }
 0xc8a   : > { %v991_v2 = vpop.permute.xlu1 %990 }
 0xc8b   : > { %v1183_v40 = vadd.f32 %v4084_v54, %v991_v2  ;;  %v3143_v54 = vld [vmem:[%s4529_s7 + $0x68] sm:$0xff] }
 0xc8e   : > { %v3719_v35 = vpop.eup %3718  ;;  %v2747_v27 = vpop.permute.xlu1 %2746 }
 0xc8f   : > { %v2528_v36 = vsel %vm1350_vm1, %v3719_v35, 0.0 }
 0xc90   : > { %v3721_v37 = vpop.eup %3720  ;;  %2529 = vadd.xlane.f32.xlu0 %v2528_v36 }
 0xc91   : > { %v2525_v48 = vsel %vm1350_vm1, %v3721_v37, 0.0 }
 0xc92   : > { %v2757_v32 = vpop.permute.xlu1 %2756 }
 0xc94   : > { %2526 = vadd.xlane.f32.xlu0 %v2525_v48 }
 0xcaa   : > { %980 = vperm.xlu0 %3688, %v502_v50  }
 0xcae   : > { %2741 = vperm.xlu0 %3688, %v505_v51  }
 0xcb2   : > { %2751 = vperm.xlu0 %3688, %v507_v53  }
 0xcb6   : > { %2826 = vperm.xlu0 %3688, %v516_v38  }
 0xcba   : > { %2816 = vperm.xlu0 %3688, %v514_v39  }
 0xcbe   : > { %2932 = vperm.xlu0 %3688, %v521_v45  }
 0xcc2   : > { %2942 = vperm.xlu0 %3688, %v523_v59  }
 0xd19   : > { %v2530_v33 = vpop.xlane.xlu0 %2529 }
 0xd1a   : > { %3722 = vrcp.f32 %v2530_v33 }
 0xd1d   : > { %v2527_v60 = vpop.xlane.xlu0 %2526 }
 0xd1e   : > { %3724 = vrcp.f32 %v2527_v60 }
 0xd25   : > { %v981_v1 = vpop.permute.xlu0 %980 }
 0xd26   : > { %v1173_v19 = vadd.f32 %v4080_v52, %v981_v1 }
 0xd27   : > { %v3723_v31 = vpop.eup %3722 }
 0xd28   : > { %v2534_v61 = vmul.f32 %v3723_v31, %v3719_v35 }
 0xd29   : > { %v2742_v5 = vpop.permute.xlu0 %2741 }
 0xd2a   : > { %3626 = vmatprep.subr.msk.mxu0 %vm1350_vm1, %v2534_v61 }
 0xd2b   : > { %v3725_v62 = vpop.eup %3724  ;;  %3627 = vmatpush3.xpose.msk.msra.mxu0 %vm1350_vm1, %v2534_v61 }
 0xd2c   : > { %v2533_v0 = vmul.f32 %v3725_v62, %v3721_v37 }
 0xd2d   : > { %v2752_v23 = vpop.permute.xlu0 %2751 }
 0xd2e   : > { %3628 = vmatprep.subr.msk.mxu0 %vm1350_vm1, %v2533_v0 }
 0xd2f   : > { %3629 = vmatpush3.xpose.msk.msra.mxu0 %vm1350_vm1, %v2533_v0 }
 0xd32   : > { %3631 = vmatmul.mubr.msk.f32.vlgmr.msra.gmra.mxu0 %vm1350_vm1, %v1173_v19 }
 0xd33   : > { %3633 = vmatprep.mubr.msk.f32.mxu0 %vm1350_vm1, %v1178_v28 }
 0xd36   : > { %3634 = vmatmul.mubr.msk.f32.gmra.mxu0 %vm1350_vm1, %v1183_v40 }
 0xd37   : > { %3658 = vmatprep.mubr.msk.f32.mxu0 %vm606_vm0, %v509_v17 }
 0xdf2   : > { %v3632_v43 = vpop.f32.mrf.mxu0 }
 0xdf4   : > { %v2619_v3 = vpop.f32.mrf.mxu0 }
 0xdf6   : > { %v3635_v52 = vpop.f32.mrf.mxu0 }
 0xdf7   : > { %3636 = vmatprep.subr.mxu1 %v3635_v52 }
 0xdf8   : > { %v2629_v55 = vpop.f32.mrf.mxu0  ;;  %3637 = vmatpush3.msra.mxu1 %v3635_v52 }
 0xdf9   : > { %3638 = vmatprep.subr.mxu1 %v2629_v55 }
 0xdfa   : > { %3639 = vmatpush3.msra.mxu1 %v2629_v55 }
 0xdfb   : > { %3640 = vmatprep.subr.mxu1 %v3632_v43 }
 0xdfc   : > { %3641 = vmatpush3.msra.mxu1 %v3632_v43 }
 0xdfd   : > { %3642 = vmatprep.subr.mxu1 %v2619_v3 }
 0xdfe   : > { %3643 = vmatpush3.msra.mxu1 %v2619_v3 }
 0xdff   : > { %3645 = vmatmul.mubr.msk.f32.vlgmr.msra.gmra.mxu1 %vm606_vm0, %v3143_v54 }
 0xe00   : > { %3647 = vmatprep.mubr.msk.f32.mxu1 %vm606_vm0, %v3144_v26 }
 0xe03   : > { %3648 = vmatmul.mubr.msk.f32.gmra.mxu1 %vm606_vm0, %v3145_v21 }
 0xebf   : > { %v3646_v46 = vpop.f32.mrf.mxu1 }
 0xec0   : > { %v2736_v42 = vadd.f32 %v3646_v46, %v4350_v44 }
 0xec1   : > { %v2716_v4 = vpop.f32.mrf.mxu1 }
 0xec2   : > { %v2760_v41 = vadd.f32 %v2747_v27, %v2736_v42  ;;  %v2735_v7 = vadd.f32 %v2716_v4, %v4354_v47  ;;  %v510_v42 = vld [vmem:[%s4531_s9 + $0x8] sm:$0xff]  ;;  %v512_v4 = vld [vmem:[%s4531_s9 + $0x18] sm:$0xff] }
 0xec3   : > { %v3649_v30 = vpop.f32.mrf.mxu1 }
 0xec4   : > { %v2759_v56 = vadd.f32 %v2742_v5, %v2735_v7  ;;  %v2738_v24 = vadd.f32 %v3649_v30, %v4358_v6  ;;  %v4450_v58 = vadd.f32 %v3728_v34, %v2760_v41  ;;  %v3730_v6 = vld [vmem:[%s3827_s30 + $0x18] sm:$0xff]  ;;  %v511_v5 = vld [vmem:[%s4531_s9 + $0x10] sm:$0xff]  ;;  %v517_v41 = vld [vmem:[%s4533_s11] sm:$0xff]  ;;  %v2827_v7 = vpop.permute.xlu0 %2826 }
 0xec5   : > { %v2726_v57 = vpop.f32.mrf.mxu1  ;;  %3672 = vmatprep.mubr.msk.f32.mxu1 %vm606_vm0, %v517_v41 }
 0xec6   : > { %v4453_v49 = vadd.f32 %v3729_v25, %v2759_v56  ;;  %v2762_v44 = vadd.f32 %v2757_v32, %v2738_v24  ;;  %v2737_v22 = vadd.f32 %v2726_v57, %v4360_v20  ;;  %v2768_v8 = vsel %vm1350_vm1, %v4450_v58, 0.0  ;;  %v2822_v56 = vpop.permute.xlu1 %2821 }
 0xec8   : > { %v2767_v47 = vsel %vm1350_vm1, %v4453_v49, 0.0  ;;  %v2761_v15 = vadd.f32 %v2752_v23, %v2737_v22  ;;  %v4461_v9 = vadd.f32 %v3730_v6, %v2762_v44  ;;  %v2817_v34 = vpop.permute.xlu0 %2816 }
 0xec9   : > { %v2769_v12 = vadd.f32 %v2768_v8, %v2767_v47 }
 0xeca   : > { %v4464_v11 = vadd.f32 %v3731_v10, %v2761_v15  ;;  %v2772_v20 = vsel %vm1350_vm1, %v4461_v9, 0.0  ;;  %v2812_v47 = vpop.permute.xlu1 %2811 }
 0xecc   : > { %v2770_v13 = vsel %vm1350_vm1, %v4464_v11, 0.0 }
 0xecd   : > { %v2771_v14 = vadd.f32 %v2770_v13, %v2769_v12  ;;  %v518_v12 = vld [vmem:[%s4533_s11 + $0x8] sm:$0xff]  ;;  %v519_v13 = vld [vmem:[%s4533_s11 + $0x10] sm:$0xff] }
 0xecf   : > { %v2773_v16 = vadd.f32 %v2772_v20, %v2771_v14  ;;  %v520_v14 = vld [vmem:[%s4533_s11 + $0x18] sm:$0xff]  ;;  %v2938_v20 = vpop.permute.xlu1 %2937 }
 0xed1   : > { %v2774_v18 = vrot.slane %v2773_v16, 4 }
 0xed3   : > { %v2775_v35 = vadd.f32 %v2774_v18, %v2773_v16  ;;  %v2933_v16 = vpop.permute.xlu0 %2932 }
 0xed5   : > { %v2776_v36 = vrot.slane %v2775_v35, 2 }
 0xed7   : > { %v2777_v37 = vadd.f32 %v2776_v36, %v2775_v35 }
 0xed9   : > { %v2778_v48 = vrot.slane %v2777_v37, 1 }
 0xedb   : > { %v2779_v50 = vadd.f32 %v2778_v48, %v2777_v37 }
 0xedd   : > { %v2780_v51 = vmul.f32 0.03125, %v2779_v50  ;;  %v2948_v50 = vpop.permute.xlu1 %2947 }
 0xedf   : > { %v2783_v53 = vsub.f32 %v4464_v11, %v2780_v51  ;;  %v2781_v38 = vsub.f32 %v4453_v49, %v2780_v51  ;;  %v2782_v39 = vsub.f32 %v4450_v58, %v2780_v51  ;;  %v2784_v45 = vsub.f32 %v4461_v9, %v2780_v51 }
 0xee1   : > { %v2787_v59 = vmul.f32 %v2783_v53, %v2783_v53  ;;  %v2785_v33 = vmul.f32 %v2781_v38, %v2781_v38  ;;  %v2786_v60 = vmul.f32 %v2782_v39, %v2782_v39  ;;  %v2788_v31 = vmul.f32 %v2784_v45, %v2784_v45 }
 0xee3   : > { %v2789_v61 = vsel %vm1350_vm1, %v2785_v33, 0.0  ;;  %v2790_v62 = vsel %vm1350_vm1, %v2786_v60, 0.0  ;;  %v2792_v0 = vsel %vm1350_vm1, %v2787_v59, 0.0  ;;  %v2794_v19 = vsel %vm1350_vm1, %v2788_v31, 0.0 }
 0xee4   : > { %v2791_v63 = vadd.f32 %v2790_v62, %v2789_v61 }
 0xee6   : > { %v2793_v1 = vadd.f32 %v2792_v0, %v2791_v63 }
 0xee8   : > { %v2795_v28 = vadd.f32 %v2794_v19, %v2793_v1 }
 0xeea   : > { %v2796_v2 = vrot.slane %v2795_v28, 4 }
 0xeec   : > { %v2797_v40 = vadd.f32 %v2796_v2, %v2795_v28 }
 0xeee   : > { %v2798_v29 = vrot.slane %v2797_v40, 2 }
 0xef0   : > { %v2799_v43 = vadd.f32 %v2798_v29, %v2797_v40 }
 0xef2   : > { %v2800_v3 = vrot.slane %v2799_v43, 1 }
 0xef4   : > { %v2801_v52 = vadd.f32 %v2800_v3, %v2799_v43 }
 0xef6   : > { %v2802_v55 = vmul.f32 0.03125, %v2801_v52 }
 0xef8   : > { %v2803_v54 = vadd.f32 1e-05, %v2802_v55 }
 0xefa   : > { %3726 = vrsqrt.f32 %v2803_v54 }
 0xf07   : > { %v3727_v26 = vpop.eup %3726 }
 0xf08   : > { %v2808_v21 = vmul.f32 %v3727_v26, %v2784_v45  ;;  %v2807_v17 = vmul.f32 %v3727_v26, %v2783_v53  ;;  %v2806_v27 = vmul.f32 %v3727_v26, %v2782_v39  ;;  %v2805_v46 = vmul.f32 %v3727_v26, %v2781_v38  ;;  %v2943_v39 = vpop.permute.xlu0 %2942 }
 0xf0a   : > { %3650 = vmatprep.subr.mxu0 %v2808_v21 }
 0xf0b   : > { %3651 = vmatpush3.msra.mxu0 %v2808_v21 }
 0xf0c   : > { %3652 = vmatprep.subr.mxu0 %v2807_v17 }
 0xf0d   : > { %3653 = vmatpush3.msra.mxu0 %v2807_v17 }
 0xf0e   : > { %3654 = vmatprep.subr.mxu0 %v2806_v27 }
 0xf0f   : > { %3655 = vmatpush3.msra.mxu0 %v2806_v27 }
 0xf10   : > { %3656 = vmatprep.subr.mxu0 %v2805_v46 }
 0xf11   : > { %3657 = vmatpush3.msra.mxu0 %v2805_v46 }
 0xf12   : > { %3659 = vmatmul.mubr.msk.f32.vlgmr.msra.gmra.mxu0 %vm606_vm0, %v510_v42 }
 0xf13   : > { %3661 = vmatprep.mubr.msk.f32.mxu0 %vm606_vm0, %v511_v5 }
 0xf16   : > { %3662 = vmatmul.mubr.msk.f32.gmra.mxu0 %vm606_vm0, %v512_v4 }
 0xfd2   : > { %v3660_v30 = vpop.f32.mrf.mxu0 }
 0xfd3   : > { %v2913_v44 = vadd.f32 %v3660_v30, %v2817_v34 }
 0xfd4   : > { %v2907_v24 = vpop.f32.mrf.mxu0 }
 0xfd5   : > { %v2908_v15 = vadd.f32 %v2907_v24, %v2812_v47  ;;  %v2927_v6 = vmax.f32 %v2913_v44, 0.0 }
 0xfd6   : > { %v3663_v32 = vpop.f32.mrf.mxu0 }
 0xfd7   : > { %v2923_v57 = vadd.f32 %v3663_v32, %v2827_v7  ;;  %v2926_v10 = vmax.f32 %v2908_v15, 0.0 }
 0xfd8   : > { %v2917_v25 = vpop.f32.mrf.mxu0 }
 0xfd9   : > { %v2929_v22 = vmax.f32 %v2923_v57, 0.0  ;;  %v2918_v23 = vadd.f32 %v2917_v25, %v2822_v56 }
 0xfdb   : > { %v2928_v8 = vmax.f32 %v2918_v23, 0.0  ;;  %3664 = vmatprep.subr.mxu1 %v2929_v22 }
 0xfdc   : > { %3665 = vmatpush3.msra.mxu1 %v2929_v22 }
 0xfdd   : > { %3666 = vmatprep.subr.mxu1 %v2928_v8 }
 0xfde   : > { %3667 = vmatpush3.msra.mxu1 %v2928_v8 }
 0xfdf   : > { %3668 = vmatprep.subr.mxu1 %v2927_v6 }
 0xfe0   : > { %3669 = vmatpush3.msra.mxu1 %v2927_v6 }
 0xfe1   : > { %3670 = vmatprep.subr.mxu1 %v2926_v10 }
 0xfe2   : > { %3671 = vmatpush3.msra.mxu1 %v2926_v10 }
 0xfe3   : > { %3673 = vmatmul.mubr.msk.f32.vlgmr.msra.gmra.mxu1 %vm606_vm0, %v518_v12 }
 0xfe4   : > { %3675 = vmatprep.mubr.msk.f32.mxu1 %vm606_vm0, %v519_v13 }
 0xfe7   : > { %3676 = vmatmul.mubr.msk.f32.gmra.mxu1 %vm606_vm0, %v520_v14 }
0x10a3   : > { %v3674_v18 = vpop.f32.mrf.mxu1 }
0x10a4   : > { %v3034_v35 = vadd.f32 %v3674_v18, %v2938_v20 }
0x10a5   : > { %v3028_v36 = vpop.f32.mrf.mxu1 }
0x10a6   : > { %v3048_v37 = vadd.f32 %v3034_v35, %v4450_v58  ;;  %v3029_v48 = vadd.f32 %v3028_v36, %v2933_v16 }
0x10a7   : > { %v3677_v51 = vpop.f32.mrf.mxu1 }
0x10a8   : > { %3052 = vst.msk [vmem:[%s440_s20 + $0x8] sm:$0xff] %vm1350_vm1, %v3048_v37  ;;  %v3047_v53 = vadd.f32 %v3029_v48, %v4453_v49  ;;  %v3044_v38 = vadd.f32 %v3677_v51, %v2948_v50 }
0x10a9   : > { %v3038_v45 = vpop.f32.mrf.mxu1 }
0x10aa   : > { %3051 = vst.msk [vmem:[%s440_s20] sm:$0xff] %vm1350_vm1, %v3047_v53  ;;  %v3050_v59 = vadd.f32 %v3044_v38, %v4461_v9  ;;  %v3039_v33 = vadd.f32 %v3038_v45, %v2943_v39 }
0x10ac   : > { %3054 = vst.msk [vmem:[%s440_s20 + $0x18] sm:$0xff] %vm1350_vm1, %v3050_v59  ;;  %v3049_v60 = vadd.f32 %v3039_v33, %v4464_v11 }
0x10ae   : > { %3053 = vst.msk [vmem:[%s440_s20 + $0x10] sm:$0xff] %vm1350_vm1, %v3049_v60 }
0x10af PF: > { %s23_s25 = sadd.s32 1, %s3738_s25  }
0x10b0   : > { %p20_p4 = scmp.ge.s32.totalorder %s23_s25, 4  }
0x10b2   :  { %22 = sbr.rel (!%p20_p4) target bundleno = 1 (0x1), region = 111 }

</bundles_post_ra>
